<compile_context>
chip_gen: v5e
topology: v5e:2x2
jax: 0.10.0
libtpu: 0.0.40
codegen_flags: <defaults>
</compile_context>

<pallas_src>
import jax
import jax.numpy as jnp
from jax.experimental import pallas as pl
from jax.experimental.pallas import tpu as pltpu


# ---------------------------------------------------------------------------
# Interpolation / pooling matrices (constant, parameter-free glue).
# ---------------------------------------------------------------------------
def bilinear_matrix(n_in, n_out):
    """Row-interp matrix for bilinear upsample with align_corners=True."""
    if n_in == 1:
        return jnp.ones((n_out, 1), jnp.float32)
    idx = jnp.arange(n_out, dtype=jnp.float32)
    src = idx * (n_in - 1) / max(n_out - 1, 1)
    i0 = jnp.clip(jnp.floor(src).astype(jnp.int32), 0, n_in - 2)
    frac = src - i0.astype(jnp.float32)
    cols = jnp.arange(n_in)
    m = ((cols[None, :] == i0[:, None]) * (1.0 - frac[:, None])
         + (cols[None, :] == (i0 + 1)[:, None]) * frac[:, None])
    return m.astype(jnp.float32)                              # (n_out, n_in)


def avgpool_matrix(n_in, n_out):
    """Adaptive average-pool matrix (used only by the placeholder backbone)."""
    p = jnp.arange(n_out, dtype=jnp.float32)
    start = jnp.floor(p * n_in / n_out).astype(jnp.int32)
    end = jnp.ceil((p + 1.0) * n_in / n_out).astype(jnp.int32)
    cols = jnp.arange(n_in)
    inbin = (cols[None, :] >= start[:, None]) & (cols[None, :] < end[:, None])
    w = inbin.astype(jnp.float32)
    return w / jnp.sum(w, axis=1, keepdims=True)              # (n_out, n_in)


# ---------------------------------------------------------------------------
# Fused image-path kernel: spatial pool (constant Kronecker matrix), stem
# 3->768, cnn_ 768->nef (lane-dense, channel-major), GAP->body->mlp (batched
# over the block).  Grid is over batch blocks ("parallel" -> megacore on v7x).
# ---------------------------------------------------------------------------
def _cnn_fused_kernel(img_ref, fmean_ref, kt_ref,
                      wstemT_ref, bstemc_ref, wstem_ref, bstemr_ref,
                      wcnnT_ref, bcnnc_ref, wbody_ref, bbodyr_ref,
                      wmlp_ref, bmlpr_ref,
                      local_ref, glob_ref):
    bb = img_ref.shape[0]

    kt = kt_ref[...]          # (HW, 289) bf16 composed pool operator
    wstemT = wstemT_ref[...]  # (768, C)  bf16
    wcnnT = wcnnT_ref[...]    # (nef, 768) bf16
    bstemc = bstemc_ref[...]  # (768, 1) f32
    bcnnc = bcnnc_ref[...]    # (nef, 1) f32

    # ---- local features: per-image, channel-major so everything is 289-lane
    # dense (feat (C,289) -> x1^T (768,289) -> local^T (nef,289)). ----
    for i in range(bb):
        xi = img_ref[i]                                               # (C, HW)
        feat = jnp.dot(xi, kt, preferred_element_type=jnp.float32)    # (C, 289)
        x1t = (jnp.dot(wstemT, feat.astype(jnp.bfloat16),
                       preferred_element_type=jnp.float32) + bstemc)  # (768, 289)
        local_ref[i] = (jnp.dot(wcnnT, x1t.astype(jnp.bfloat16),
                                preferred_element_type=jnp.float32) + bcnnc)

    # ---- global features: GAP (folded exactly into the precomputed fmean
    # contraction of the raw image) -> body -> mlp, batched over the block so
    # the big 768x2048 / 2048xnef weights see M=bb rows instead of M=1. ----
    fmean = jnp.concatenate([fmean_ref[i] for i in range(bb)], axis=0)  # (bb, C)
    gap = (jnp.dot(fmean.astype(jnp.bfloat16), wstem_ref[...],
                   preferred_element_type=jnp.float32) + bstemr_ref[...])   # (bb, 768)
    x2 = (jnp.dot(gap.astype(jnp.bfloat16), wbody_ref[...],
                  preferred_element_type=jnp.float32) + bbodyr_ref[...])    # (bb, 2048)
    glob = (jnp.dot(x2.astype(jnp.bfloat16), wmlp_ref[...],
                    preferred_element_type=jnp.float32) + bmlpr_ref[...])   # (bb, nef)
    for i in range(bb):
        glob_ref[i] = glob[i:i + 1, :]                                       # (1, nef)


def cnn_encoder_forward(img, params):
    """Faithful layers: init upsample, cnn_ 1x1 conv, mlp_ linear.

    Returns local features (B, nef, 289) and global features (nef, B).
    """
    B, C, H, W = img.shape
    nef = params["nef"]
    HW = H * W

    # self.init (bilinear 299x299, align_corners=True) composed with the
    # placeholder head's adaptive avg-pool (299 -> 17).  Both are linear,
    # parameter-free maps per spatial axis; their composition over BOTH axes
    # is the exact Kronecker matrix K below, applied inside the kernel — the
    # (B,3,299,299) intermediate is never materialized.
    P = avgpool_matrix(299, 17)                               # (17, 299)
    PMh = P @ bilinear_matrix(H, 299)                         # (17, H)
    PMw = P @ bilinear_matrix(W, 299)                         # (17, W)
    K = jnp.einsum('ih,jw->ijhw', PMh, PMw).reshape(17 * 17, HW)   # (289, HW)
    kt = K.T.astype(jnp.bfloat16)                             # (HW, 289)

    # Exact fold of GAP(stem(pooled)) = (img . mean_n K[n,:]) @ w_stem + b:
    # tiny parameter-free contraction of the raw input (wrapper glue).
    kbar = jnp.mean(K, axis=0)                                # (HW,)
    imgf = img.reshape(B, C, HW).astype(jnp.float32)
    fmean = (imgf @ kbar).reshape(B, 1, C)                    # (B, 1, C)
    img_in = imgf.astype(jnp.bfloat16)                        # (B, C, HW)

    # >=2 grid steps whenever B>=2 so both v7x TensorCores are used.
    bb = B if B <= 1 else min(8, (B + 1) // 2)
    gb = -(-B // bb)

    local, glob = pl.pallas_call(
        _cnn_fused_kernel,
        out_shape=(jax.ShapeDtypeStruct((B, nef, 17 * 17), jnp.float32),
                   jax.ShapeDtypeStruct((B, 1, nef), jnp.float32)),
        grid=(gb,),
        in_specs=[
            pl.BlockSpec((bb, C, HW), lambda b: (b, 0, 0)),
            pl.BlockSpec((bb, 1, C), lambda b: (b, 0, 0)),
            pl.BlockSpec((HW, 17 * 17), lambda b: (0, 0)),
            pl.BlockSpec((768, C), lambda b: (0, 0)),
            pl.BlockSpec((768, 1), lambda b: (0, 0)),
            pl.BlockSpec((C, 768), lambda b: (0, 0)),
            pl.BlockSpec((1, 768), lambda b: (0, 0)),
            pl.BlockSpec((nef, 768), lambda b: (0, 0)),
            pl.BlockSpec((nef, 1), lambda b: (0, 0)),
            pl.BlockSpec((768, 2048), lambda b: (0, 0)),
            pl.BlockSpec((1, 2048), lambda b: (0, 0)),
            pl.BlockSpec((2048, nef), lambda b: (0, 0)),
            pl.BlockSpec((1, nef), lambda b: (0, 0)),
        ],
        out_specs=(pl.BlockSpec((bb, nef, 17 * 17), lambda b: (b, 0, 0)),
                   pl.BlockSpec((bb, 1, nef), lambda b: (b, 0, 0))),
        compiler_params=pltpu.CompilerParams(
            dimension_semantics=("parallel",),
            vmem_limit_bytes=32 * 1024 * 1024),
    )(img_in, fmean, kt,
      params["w_stem"].T.astype(jnp.bfloat16),
      params["b_stem"].reshape(768, 1).astype(jnp.float32),
      params["w_stem"].astype(jnp.bfloat16),
      params["b_stem"].reshape(1, 768).astype(jnp.float32),
      params["w_cnn"].T.astype(jnp.bfloat16),
      params["b_cnn"].reshape(nef, 1).astype(jnp.float32),
      params["w_body"].astype(jnp.bfloat16),
      params["b_body"].reshape(1, 2048).astype(jnp.float32),
      params["w_mlp"].astype(jnp.bfloat16),
      params["b_mlp"].reshape(1, nef).astype(jnp.float32))

    local_image_features = local                              # (B, nef, 289)
    global_image_features = glob.reshape(B, nef).T            # (nef, B)
    return local_image_features, global_image_features


# ---------------------------------------------------------------------------
# Bidirectional, length-masked LSTM kernel (packed-sequence semantics).
# Input projection absorbed into the kernel; single block-diagonal recurrent
# dot drives both directions; fully static (unrolled) time loop.
# ---------------------------------------------------------------------------
def _bilstm_kernel(valid_ref, emb_ref, wih_ref, bias_ref, whh_ref,
                   out_ref, hid_ref, xsc_ref):
    bb, T, _ = emb_ref.shape
    H = whh_ref.shape[0] // 2

    wih = wih_ref[...]                                  # (E, 8H) f32
    bias = bias_ref[...]                                # (1, 8H) f32
    whh = whh_ref[...]                                  # (2H, 8H) f32 block-diag

    # Hoisted input projection for all timesteps & both directions (outside
    # the serial time loop): bb dots of (T, E) @ (E, 8H) into VMEM scratch.
    for i in range(bb):
        xsc_ref[i] = (jnp.dot(emb_ref[i], wih,
                              preferred_element_type=jnp.float32) + bias)

    def gates_to_hc(g, c):
        ig = jax.nn.sigmoid(g[:, 0 * H:1 * H])
        fg = jax.nn.sigmoid(g[:, 1 * H:2 * H])
        cand = jnp.tanh(g[:, 2 * H:3 * H])
        og = jax.nn.sigmoid(g[:, 3 * H:4 * H])
        c_new = fg * c + ig * cand
        return og * jnp.tanh(c_new), c_new

    zeros = jnp.zeros((bb, H), jnp.float32)
    h_f, c_f, h_b, c_b = zeros, zeros, zeros, zeros
    out_f = [None] * T
    out_b = [None] * T

    # One static loop drives BOTH directions (fwd at t=k, bwd at t=T-1-k).
    # A single (bb, 2H) @ (2H, 8H) block-diagonal dot produces both gate sets.
    for k in range(T):
        t_f = k
        t_b = T - 1 - k
        hcat = jnp.concatenate([h_f, h_b], axis=1)                      # (bb, 2H)
        rec = jnp.dot(hcat, whh, preferred_element_type=jnp.float32)    # (bb, 8H)
        g_f = xsc_ref[:, t_f, 0:4 * H] + rec[:, 0:4 * H]
        g_b = xsc_ref[:, t_b, 4 * H:8 * H] + rec[:, 4 * H:8 * H]
        hf_new, cf_new = gates_to_hc(g_f, c_f)
        hb_new, cb_new = gates_to_hc(g_b, c_b)
        m_f = valid_ref[:, t_f, :] > 0.0                                # (bb, 1)
        m_b = valid_ref[:, t_b, :] > 0.0
        # packed-sequence semantics: padded timesteps emit zeros
        out_f[t_f] = jnp.where(m_f, hf_new, 0.0)
        out_b[t_b] = jnp.where(m_b, hb_new, 0.0)
        # state frozen past each sequence length
        h_f = jnp.where(m_f, hf_new, h_f)
        c_f = jnp.where(m_f, cf_new, c_f)
        h_b = jnp.where(m_b, hb_new, h_b)
        c_b = jnp.where(m_b, cb_new, c_b)

    # Single combined (bb, 2H) store per timestep (both directions at once).
    for t in range(T):
        out_ref[:, t, :] = jnp.concatenate([out_f[t], out_b[t]], axis=1)
    hcat = jnp.concatenate([h_f, h_b], axis=1)                          # (bb, 2H)
    for i in range(bb):
        hid_ref[i] = hcat[i:i + 1, :]


def bilstm_forward(emb_bte, lengths, params, hidden):
    """emb_bte: (B, T, E); returns words (B, 2H, T) and final hidden (B, 2H)."""
    B, T, E = emb_bte.shape
    H = hidden
    lengths = jnp.asarray(lengths, jnp.int32)
    # Per-(b, t) validity mask, precomputed once (wrapper glue, tiny).
    valid = (jnp.arange(T, dtype=jnp.int32)[None, :] < lengths[:, None])
    valid = valid.astype(jnp.float32).reshape(B, T, 1)

    # Stack both directions once: input projection weight (E, 8H), summed
    # LSTM bias (1, 8H), and a block-diagonal recurrent weight (2H, 8H) so a
    # single per-step dot of [h_f | h_b] produces both directions' gates.
    wih = jnp.concatenate([params["wih_f"], params["wih_b"]], axis=1)    # (E, 8H)
    bias = jnp.concatenate([params["b_f"], params["b_b"]], axis=1)       # (1, 8H)
    zpad = jnp.zeros((H, 4 * H), jnp.float32)
    whh = jnp.concatenate(
        [jnp.concatenate([params["whh_f"], zpad], axis=1),
         jnp.concatenate([zpad, params["whh_b"]], axis=1)], axis=0)      # (2H, 8H)

    # >=2 "parallel" grid steps whenever B>=2 (v7x megacore); harmless on
    # single-TC v5e/v6e.
    bb = B if B <= 1 else min(256, (B + 1) // 2)
    gb = -(-B // bb)

    out, hid = pl.pallas_call(
        _bilstm_kernel,
        out_shape=(jax.ShapeDtypeStruct((B, T, 2 * H), jnp.float32),
                   jax.ShapeDtypeStruct((B, 1, 2 * H), jnp.float32)),
        grid=(gb,),
        in_specs=[pl.BlockSpec((bb, T, 1), lambda b: (b, 0, 0)),
                  pl.BlockSpec((bb, T, E), lambda b: (b, 0, 0)),
                  pl.BlockSpec((E, 8 * H), lambda b: (0, 0)),
                  pl.BlockSpec((1, 8 * H), lambda b: (0, 0)),
                  pl.BlockSpec((2 * H, 8 * H), lambda b: (0, 0))],
        out_specs=(pl.BlockSpec((bb, T, 2 * H), lambda b: (b, 0, 0)),
                   pl.BlockSpec((bb, 1, 2 * H), lambda b: (b, 0, 0))),
        scratch_shapes=[pltpu.VMEM((bb, T, 8 * H), jnp.float32)],
        compiler_params=pltpu.CompilerParams(
            dimension_semantics=("parallel",),
            vmem_limit_bytes=32 * 1024 * 1024),
    )(valid, emb_bte.astype(jnp.float32), wih, bias, whh)

    words = jnp.transpose(out, (0, 2, 1))                    # (B, 2H, T)
    return words, hid.reshape(B, 2 * H)


# ---------------------------------------------------------------------------
# RNN_ENCODER / DAMSM forward.
# ---------------------------------------------------------------------------
def rnn_encoder_forward(seq, seq_length, params):
    emb = params["emb_table"][seq]        # embedding lookup (XLA gather, glue)
    # nn.Dropout(p=0.1) is identity at inference time.
    words, hid = bilstm_forward(emb, seq_length, params, hidden=params["h_size"])
    words_embedding = words               # (B, 2H, T)
    global_sentence_embedding = hid.T     # (2H, B)
    return words_embedding, global_sentence_embedding


def damsm_forward(params, img, seq, seq_length):
    words_features, sentence_features = rnn_encoder_forward(seq, seq_length, params)
    local_image_features, global_image_features = cnn_encoder_forward(img, params)
    return (words_features, sentence_features,
            local_image_features, global_image_features)


# ---------------------------------------------------------------------------
# Deterministic parameter initialization (synthetic weights, no checkpoint).
# NOTE: b_f / b_b are the pre-summed PyTorch LSTM biases (b_ih + b_hh).
# ---------------------------------------------------------------------------
def init_params(key, vocab_size=50, common_space_dim=32, e_dim=16):
    h = common_space_dim // 2
    nef = common_space_dim
    ks = jax.random.split(key, 15)
    u = lambda k, shape: jax.random.uniform(k, shape, jnp.float32, -0.1, 0.1)
    return dict(
        h_size=h, nef=nef, e_dim=e_dim,
        # RNN_ENCODER
        emb_table=u(ks[0], (vocab_size, e_dim)),
        wih_f=u(ks[1], (e_dim, 4 * h)), whh_f=u(ks[2], (h, 4 * h)),
        b_f=u(ks[3], (1, 4 * h)),
        wih_b=u(ks[4], (e_dim, 4 * h)), whh_b=u(ks[5], (h, 4 * h)),
        b_b=u(ks[6], (1, 4 * h)),
        # CNN_ENCODER (faithful layers)
        w_cnn=u(ks[7], (768, nef)), b_cnn=u(ks[8], (nef,)),
        w_mlp=u(ks[9], (2048, nef)), b_mlp=u(ks[10], (nef,)),
        # placeholder backbone projections (stand-in for pretrained IV3)
        w_stem=u(ks[11], (3, 768)), b_stem=u(ks[12], (768,)),
        w_body=u(ks[13], (768, 2048)), b_body=u(ks[14], (2048,)),
    )


if __name__ == "__main__":
    key = jax.random.PRNGKey(0)
    k_img, k_seq = jax.random.split(key, 2)

    B, T, vocab = 2, 8, 50
    img = jax.random.uniform(k_img, (B, 3, 16, 16), jnp.float32)       # NCHW
    seq = jax.random.randint(k_seq, (B, T), 1, vocab)
    seq_length = jnp.array([8, 5], jnp.int32)  # descending (pack_padded_sequence)

    params = init_params(jax.random.PRNGKey(42),
                         vocab_size=vocab, common_space_dim=32, e_dim=16)

    outs = damsm_forward(params, img, seq, seq_length)
    outs = jax.block_until_ready(outs)
    wf, sf, lf, gf = outs

    assert wf.shape == (B, 32, T)          # words_features        (B, 2H, T)
    assert sf.shape == (32, B)             # sentence_features     (2H, B)
    assert lf.shape == (B, 32, 17 * 17)    # local_image_features  (B, nef, 289)
    assert gf.shape == (32, B)             # global_image_features (nef, B)
    assert all(bool(jnp.all(jnp.isfinite(o))) for o in (wf, sf, lf, gf))

    print("KERNEL_OK")
</pallas_src>

<mosaic_0001>
module attributes {stable_mosaic.version = 11 : i64} {
  func.func @_bilstm_kernel(%arg0: i32, %arg1: memref<1x8x1xf32, #tpu.memory_space<vmem>>, %arg2: memref<1x8x16xf32, #tpu.memory_space<vmem>>, %arg3: memref<16x128xf32, #tpu.memory_space<vmem>>, %arg4: memref<1x128xf32, #tpu.memory_space<vmem>>, %arg5: memref<32x128xf32, #tpu.memory_space<vmem>>, %arg6: memref<1x8x32xf32, #tpu.memory_space<vmem>>, %arg7: memref<1x1x32xf32, #tpu.memory_space<vmem>>, %arg8: memref<1x8x128xf32, #tpu.memory_space<vmem>>) attributes {dimension_semantics = [#tpu.dimension_semantics<parallel>], iteration_bounds = array<i64: 2>, scalar_prefetch = 0 : i64, scratch_operands = 1 : i64, tpu.core_type = #tpu.core_type<tc>, window_params = [{transform_indices = @transform_0, window_bounds = array<i64: 1, 8, 1>}, {transform_indices = @transform_1, window_bounds = array<i64: 1, 8, 16>}, {pipeline_mode = #tpu.pipeline_mode<synchronous>, transform_indices = @transform_2, window_bounds = array<i64: 16, 128>}, {pipeline_mode = #tpu.pipeline_mode<synchronous>, transform_indices = @transform_3, window_bounds = array<i64: 1, 128>}, {pipeline_mode = #tpu.pipeline_mode<synchronous>, transform_indices = @transform_4, window_bounds = array<i64: 32, 128>}, {transform_indices = @transform_5, window_bounds = array<i64: 1, 8, 32>}, {transform_indices = @transform_6, window_bounds = array<i64: 1, 1, 32>}]} {
    %c0 = arith.constant 0 : index
    %c0_0 = arith.constant 0 : index
    %0 = vector.load %arg3[%c0, %c0_0] : memref<16x128xf32, #tpu.memory_space<vmem>>, vector<16x128xf32>
    %c0_1 = arith.constant 0 : index
    %c0_2 = arith.constant 0 : index
    %1 = vector.load %arg4[%c0_1, %c0_2] : memref<1x128xf32, #tpu.memory_space<vmem>>, vector<1x128xf32>
    %c0_3 = arith.constant 0 : index
    %c0_4 = arith.constant 0 : index
    %2 = vector.load %arg5[%c0_3, %c0_4] : memref<32x128xf32, #tpu.memory_space<vmem>>, vector<32x128xf32>
    %c0_5 = arith.constant 0 : index
    %c0_6 = arith.constant 0 : index
    %c0_7 = arith.constant 0 : index
    %3 = vector.load %arg2[%c0_5, %c0_6, %c0_7] : memref<1x8x16xf32, #tpu.memory_space<vmem>>, vector<1x8x16xf32>
    %4 = vector.shape_cast %3 : vector<1x8x16xf32> to vector<8x16xf32>
    %cst = arith.constant dense<0.000000e+00> : vector<8x128xf32>
    %5 = tpu.matmul %4, %0, %cst {dimension_numbers = #tpu.dot_dimension_numbers<[1], [0], [0], [1], [0, 0, 1, 1], [], []>} : vector<8x16xf32>, vector<16x128xf32>, vector<8x128xf32> -> vector<8x128xf32>
    %6 = vector.broadcast %1 : vector<1x128xf32> to vector<8x128xf32>
    %7 = arith.addf %5, %6 : vector<8x128xf32>
    %c0_8 = arith.constant 0 : index
    %c0_9 = arith.constant 0 : index
    %c0_10 = arith.constant 0 : index
    %8 = vector.load %arg8[%c0_8, %c0_9, %c0_10] : memref<1x8x128xf32, #tpu.memory_space<vmem>>, vector<1x8x128xf32>
    %9 = vector.shape_cast %8 : vector<1x8x128xf32> to vector<8x128xf32>
    %10 = vector.shape_cast %7 : vector<8x128xf32> to vector<1x8x128xf32>
    tpu.vector_store %arg8[%c0_8, %c0_9, %c0_10], %10 {strides = array<i32>} : memref<1x8x128xf32, #tpu.memory_space<vmem>>, vector<1x8x128xf32>,
    %cst_11 = arith.constant 0.000000e+00 : f32
    %11 = vector.broadcast %cst_11 : f32 to vector<1x16xf32>
    %12 = tpu.concatenate %11, %11 in 1 : vector<1x16xf32>, vector<1x16xf32> -> vector<1x32xf32>
    %cst_12 = arith.constant dense<0.000000e+00> : vector<1x128xf32>
    %13 = tpu.matmul %12, %2, %cst_12 {dimension_numbers = #tpu.dot_dimension_numbers<[1], [0], [0], [1], [0, 0, 1, 1], [], []>} : vector<1x32xf32>, vector<32x128xf32>, vector<1x128xf32> -> vector<1x128xf32>
    %c0_13 = arith.constant 0 : index
    %c0_14 = arith.constant 0 : index
    %c0_15 = arith.constant 0 : index
    %14 = vector.load %arg8[%c0_13, %c0_14, %c0_15] : memref<1x8x128xf32, #tpu.memory_space<vmem>>, vector<1x1x64xf32>
    %15 = vector.shape_cast %14 : vector<1x1x64xf32> to vector<1x64xf32>
    %16 = vector.extract_strided_slice %13 {offsets = [0, 0], sizes = [1, 64], strides = [1, 1]} : vector<1x128xf32> to vector<1x64xf32>
    %17 = arith.addf %15, %16 : vector<1x64xf32>
    %c0_16 = arith.constant 0 : index
    %c7 = arith.constant 7 : index
    %c64 = arith.constant 64 : index
    %18 = vector.load %arg8[%c0_16, %c7, %c64] : memref<1x8x128xf32, #tpu.memory_space<vmem>>, vector<1x1x64xf32>
    %19 = vector.shape_cast %18 : vector<1x1x64xf32> to vector<1x64xf32>
    %20 = vector.extract_strided_slice %13 {offsets = [0, 64], sizes = [1, 64], strides = [1, 1]} : vector<1x128xf32> to vector<1x64xf32>
    %21 = arith.addf %19, %20 : vector<1x64xf32>
    %22 = vector.extract_strided_slice %17 {offsets = [0, 0], sizes = [1, 16], strides = [1, 1]} : vector<1x64xf32> to vector<1x16xf32>
    %23 = arith.negf %22 : vector<1x16xf32>
    %24 = math.exp %23 : vector<1x16xf32>
    %cst_17 = arith.constant 1.000000e+00 : f32
    %25 = vector.broadcast %cst_17 : f32 to vector<1x16xf32>
    %26 = arith.addf %25, %24 : vector<1x16xf32>
    %27 = arith.divf %25, %26 : vector<1x16xf32>
    %28 = vector.extract_strided_slice %17 {offsets = [0, 16], sizes = [1, 16], strides = [1, 1]} : vector<1x64xf32> to vector<1x16xf32>
    %29 = arith.negf %28 : vector<1x16xf32>
    %30 = math.exp %29 : vector<1x16xf32>
    %cst_18 = arith.constant 1.000000e+00 : f32
    %31 = vector.broadcast %cst_18 : f32 to vector<1x16xf32>
    %32 = arith.addf %31, %30 : vector<1x16xf32>
    %33 = arith.divf %31, %32 : vector<1x16xf32>
    %34 = vector.extract_strided_slice %17 {offsets = [0, 32], sizes = [1, 16], strides = [1, 1]} : vector<1x64xf32> to vector<1x16xf32>
    %35 = math.tanh %34 : vector<1x16xf32>
    %36 = vector.extract_strided_slice %17 {offsets = [0, 48], sizes = [1, 16], strides = [1, 1]} : vector<1x64xf32> to vector<1x16xf32>
    %37 = arith.negf %36 : vector<1x16xf32>
    %38 = math.exp %37 : vector<1x16xf32>
    %cst_19 = arith.constant 1.000000e+00 : f32
    %39 = vector.broadcast %cst_19 : f32 to vector<1x16xf32>
    %40 = arith.addf %39, %38 : vector<1x16xf32>
    %41 = arith.divf %39, %40 : vector<1x16xf32>
    %42 = arith.mulf %33, %11 : vector<1x16xf32>
    %43 = arith.mulf %27, %35 : vector<1x16xf32>
    %44 = arith.addf %42, %43 : vector<1x16xf32>
    %45 = math.tanh %44 : vector<1x16xf32>
    %46 = arith.mulf %41, %45 : vector<1x16xf32>
    %47 = vector.extract_strided_slice %21 {offsets = [0, 0], sizes = [1, 16], strides = [1, 1]} : vector<1x64xf32> to vector<1x16xf32>
    %48 = arith.negf %47 : vector<1x16xf32>
    %49 = math.exp %48 : vector<1x16xf32>
    %cst_20 = arith.constant 1.000000e+00 : f32
    %50 = vector.broadcast %cst_20 : f32 to vector<1x16xf32>
    %51 = arith.addf %50, %49 : vector<1x16xf32>
    %52 = arith.divf %50, %51 : vector<1x16xf32>
    %53 = vector.extract_strided_slice %21 {offsets = [0, 16], sizes = [1, 16], strides = [1, 1]} : vector<1x64xf32> to vector<1x16xf32>
    %54 = arith.negf %53 : vector<1x16xf32>
    %55 = math.exp %54 : vector<1x16xf32>
    %cst_21 = arith.constant 1.000000e+00 : f32
    %56 = vector.broadcast %cst_21 : f32 to vector<1x16xf32>
    %57 = arith.addf %56, %55 : vector<1x16xf32>
    %58 = arith.divf %56, %57 : vector<1x16xf32>
    %59 = vector.extract_strided_slice %21 {offsets = [0, 32], sizes = [1, 16], strides = [1, 1]} : vector<1x64xf32> to vector<1x16xf32>
    %60 = math.tanh %59 : vector<1x16xf32>
    %61 = vector.extract_strided_slice %21 {offsets = [0, 48], sizes = [1, 16], strides = [1, 1]} : vector<1x64xf32> to vector<1x16xf32>
    %62 = arith.negf %61 : vector<1x16xf32>
    %63 = math.exp %62 : vector<1x16xf32>
    %cst_22 = arith.constant 1.000000e+00 : f32
    %64 = vector.broadcast %cst_22 : f32 to vector<1x16xf32>
    %65 = arith.addf %64, %63 : vector<1x16xf32>
    %66 = arith.divf %64, %65 : vector<1x16xf32>
    %67 = arith.mulf %58, %11 : vector<1x16xf32>
    %68 = arith.mulf %52, %60 : vector<1x16xf32>
    %69 = arith.addf %67, %68 : vector<1x16xf32>
    %70 = math.tanh %69 : vector<1x16xf32>
    %71 = arith.mulf %66, %70 : vector<1x16xf32>
    %c0_23 = arith.constant 0 : index
    %c0_24 = arith.constant 0 : index
    %c0_25 = arith.constant 0 : index
    %72 = vector.load %arg1[%c0_23, %c0_24, %c0_25] : memref<1x8x1xf32, #tpu.memory_space<vmem>>, vector<1x1x1xf32>
    %73 = vector.shape_cast %72 : vector<1x1x1xf32> to vector<1x1xf32>
    %cst_26 = arith.constant 0.000000e+00 : f32
    %74 = vector.broadcast %cst_26 : f32 to vector<1x1xf32>
    %75 = arith.cmpf ogt, %73, %74 : vector<1x1xf32>
    %c0_27 = arith.constant 0 : index
    %c7_28 = arith.constant 7 : index
    %c0_29 = arith.constant 0 : index
    %76 = vector.load %arg1[%c0_27, %c7_28, %c0_29] : memref<1x8x1xf32, #tpu.memory_space<vmem>>, vector<1x1x1xf32>
    %77 = vector.shape_cast %76 : vector<1x1x1xf32> to vector<1x1xf32>
    %cst_30 = arith.constant 0.000000e+00 : f32
    %78 = vector.broadcast %cst_30 : f32 to vector<1x1xf32>
    %79 = arith.cmpf ogt, %77, %78 : vector<1x1xf32>
    %cst_31 = arith.constant 0.000000e+00 : f32
    %80 = vector.shape_cast %75 : vector<1x1xi1> to vector<1x1xi1>
    %81 = vector.broadcast %80 : vector<1x1xi1> to vector<1x16xi1>
    %82 = vector.broadcast %cst_31 : f32 to vector<1x16xf32>
    %83 = arith.select %81, %46, %82 : vector<1x16xi1>, vector<1x16xf32>
    %cst_32 = arith.constant 0.000000e+00 : f32
    %84 = vector.shape_cast %79 : vector<1x1xi1> to vector<1x1xi1>
    %85 = vector.broadcast %84 : vector<1x1xi1> to vector<1x16xi1>
    %86 = vector.broadcast %cst_32 : f32 to vector<1x16xf32>
    %87 = arith.select %85, %71, %86 : vector<1x16xi1>, vector<1x16xf32>
    %88 = vector.shape_cast %75 : vector<1x1xi1> to vector<1x1xi1>
    %89 = vector.broadcast %88 : vector<1x1xi1> to vector<1x16xi1>
    %90 = arith.select %89, %46, %11 : vector<1x16xi1>, vector<1x16xf32>
    %91 = vector.shape_cast %75 : vector<1x1xi1> to vector<1x1xi1>
    %92 = vector.broadcast %91 : vector<1x1xi1> to vector<1x16xi1>
    %93 = arith.select %92, %44, %11 : vector<1x16xi1>, vector<1x16xf32>
    %94 = vector.shape_cast %79 : vector<1x1xi1> to vector<1x1xi1>
    %95 = vector.broadcast %94 : vector<1x1xi1> to vector<1x16xi1>
    %96 = arith.select %95, %71, %11 : vector<1x16xi1>, vector<1x16xf32>
    %97 = vector.shape_cast %79 : vector<1x1xi1> to vector<1x1xi1>
    %98 = vector.broadcast %97 : vector<1x1xi1> to vector<1x16xi1>
    %99 = arith.select %98, %69, %11 : vector<1x16xi1>, vector<1x16xf32>
    %100 = tpu.concatenate %90, %96 in 1 : vector<1x16xf32>, vector<1x16xf32> -> vector<1x32xf32>
    %cst_33 = arith.constant dense<0.000000e+00> : vector<1x128xf32>
    %101 = tpu.matmul %100, %2, %cst_33 {dimension_numbers = #tpu.dot_dimension_numbers<[1], [0], [0], [1], [0, 0, 1, 1], [], []>} : vector<1x32xf32>, vector<32x128xf32>, vector<1x128xf32> -> vector<1x128xf32>
    %c0_34 = arith.constant 0 : index
    %c1 = arith.constant 1 : index
    %c0_35 = arith.constant 0 : index
    %102 = vector.load %arg8[%c0_34, %c1, %c0_35] : memref<1x8x128xf32, #tpu.memory_space<vmem>>, vector<1x1x64xf32>
    %103 = vector.shape_cast %102 : vector<1x1x64xf32> to vector<1x64xf32>
    %104 = vector.extract_strided_slice %101 {offsets = [0, 0], sizes = [1, 64], strides = [1, 1]} : vector<1x128xf32> to vector<1x64xf32>
    %105 = arith.addf %103, %104 : vector<1x64xf32>
    %c0_36 = arith.constant 0 : index
    %c6 = arith.constant 6 : index
    %c64_37 = arith.constant 64 : index
    %106 = vector.load %arg8[%c0_36, %c6, %c64_37] : memref<1x8x128xf32, #tpu.memory_space<vmem>>, vector<1x1x64xf32>
    %107 = vector.shape_cast %106 : vector<1x1x64xf32> to vector<1x64xf32>
    %108 = vector.extract_strided_slice %101 {offsets = [0, 64], sizes = [1, 64], strides = [1, 1]} : vector<1x128xf32> to vector<1x64xf32>
    %109 = arith.addf %107, %108 : vector<1x64xf32>
    %110 = vector.extract_strided_slice %105 {offsets = [0, 0], sizes = [1, 16], strides = [1, 1]} : vector<1x64xf32> to vector<1x16xf32>
    %111 = arith.negf %110 : vector<1x16xf32>
    %112 = math.exp %111 : vector<1x16xf32>
    %cst_38 = arith.constant 1.000000e+00 : f32
    %113 = vector.broadcast %cst_38 : f32 to vector<1x16xf32>
    %114 = arith.addf %113, %112 : vector<1x16xf32>
    %115 = arith.divf %113, %114 : vector<1x16xf32>
    %116 = vector.extract_strided_slice %105 {offsets = [0, 16], sizes = [1, 16], strides = [1, 1]} : vector<1x64xf32> to vector<1x16xf32>
    %117 = arith.negf %116 : vector<1x16xf32>
    %118 = math.exp %117 : vector<1x16xf32>
    %cst_39 = arith.constant 1.000000e+00 : f32
    %119 = vector.broadcast %cst_39 : f32 to vector<1x16xf32>
    %120 = arith.addf %119, %118 : vector<1x16xf32>
    %121 = arith.divf %119, %120 : vector<1x16xf32>
    %122 = vector.extract_strided_slice %105 {offsets = [0, 32], sizes = [1, 16], strides = [1, 1]} : vector<1x64xf32> to vector<1x16xf32>
    %123 = math.tanh %122 : vector<1x16xf32>
    %124 = vector.extract_strided_slice %105 {offsets = [0, 48], sizes = [1, 16], strides = [1, 1]} : vector<1x64xf32> to vector<1x16xf32>
    %125 = arith.negf %124 : vector<1x16xf32>
    %126 = math.exp %125 : vector<1x16xf32>
    %cst_40 = arith.constant 1.000000e+00 : f32
    %127 = vector.broadcast %cst_40 : f32 to vector<1x16xf32>
    %128 = arith.addf %127, %126 : vector<1x16xf32>
    %129 = arith.divf %127, %128 : vector<1x16xf32>
    %130 = arith.mulf %121, %93 : vector<1x16xf32>
    %131 = arith.mulf %115, %123 : vector<1x16xf32>
    %132 = arith.addf %130, %131 : vector<1x16xf32>
    %133 = math.tanh %132 : vector<1x16xf32>
    %134 = arith.mulf %129, %133 : vector<1x16xf32>
    %135 = vector.extract_strided_slice %109 {offsets = [0, 0], sizes = [1, 16], strides = [1, 1]} : vector<1x64xf32> to vector<1x16xf32>
    %136 = arith.negf %135 : vector<1x16xf32>
    %137 = math.exp %136 : vector<1x16xf32>
    %cst_41 = arith.constant 1.000000e+00 : f32
    %138 = vector.broadcast %cst_41 : f32 to vector<1x16xf32>
    %139 = arith.addf %138, %137 : vector<1x16xf32>
    %140 = arith.divf %138, %139 : vector<1x16xf32>
    %141 = vector.extract_strided_slice %109 {offsets = [0, 16], sizes = [1, 16], strides = [1, 1]} : vector<1x64xf32> to vector<1x16xf32>
    %142 = arith.negf %141 : vector<1x16xf32>
    %143 = math.exp %142 : vector<1x16xf32>
    %cst_42 = arith.constant 1.000000e+00 : f32
    %144 = vector.broadcast %cst_42 : f32 to vector<1x16xf32>
    %145 = arith.addf %144, %143 : vector<1x16xf32>
    %146 = arith.divf %144, %145 : vector<1x16xf32>
    %147 = vector.extract_strided_slice %109 {offsets = [0, 32], sizes = [1, 16], strides = [1, 1]} : vector<1x64xf32> to vector<1x16xf32>
    %148 = math.tanh %147 : vector<1x16xf32>
    %149 = vector.extract_strided_slice %109 {offsets = [0, 48], sizes = [1, 16], strides = [1, 1]} : vector<1x64xf32> to vector<1x16xf32>
    %150 = arith.negf %149 : vector<1x16xf32>
    %151 = math.exp %150 : vector<1x16xf32>
    %cst_43 = arith.constant 1.000000e+00 : f32
    %152 = vector.broadcast %cst_43 : f32 to vector<1x16xf32>
    %153 = arith.addf %152, %151 : vector<1x16xf32>
    %154 = arith.divf %152, %153 : vector<1x16xf32>
    %155 = arith.mulf %146, %99 : vector<1x16xf32>
    %156 = arith.mulf %140, %148 : vector<1x16xf32>
    %157 = arith.addf %155, %156 : vector<1x16xf32>
    %158 = math.tanh %157 : vector<1x16xf32>
    %159 = arith.mulf %154, %158 : vector<1x16xf32>
    %c0_44 = arith.constant 0 : index
    %c1_45 = arith.constant 1 : index
    %c0_46 = arith.constant 0 : index
    %160 = vector.load %arg1[%c0_44, %c1_45, %c0_46] : memref<1x8x1xf32, #tpu.memory_space<vmem>>, vector<1x1x1xf32>
    %161 = vector.shape_cast %160 : vector<1x1x1xf32> to vector<1x1xf32>
    %cst_47 = arith.constant 0.000000e+00 : f32
    %162 = vector.broadcast %cst_47 : f32 to vector<1x1xf32>
    %163 = arith.cmpf ogt, %161, %162 : vector<1x1xf32>
    %c0_48 = arith.constant 0 : index
    %c6_49 = arith.constant 6 : index
    %c0_50 = arith.constant 0 : index
    %164 = vector.load %arg1[%c0_48, %c6_49, %c0_50] : memref<1x8x1xf32, #tpu.memory_space<vmem>>, vector<1x1x1xf32>
    %165 = vector.shape_cast %164 : vector<1x1x1xf32> to vector<1x1xf32>
    %cst_51 = arith.constant 0.000000e+00 : f32
    %166 = vector.broadcast %cst_51 : f32 to vector<1x1xf32>
    %167 = arith.cmpf ogt, %165, %166 : vector<1x1xf32>
    %cst_52 = arith.constant 0.000000e+00 : f32
    %168 = vector.shape_cast %163 : vector<1x1xi1> to vector<1x1xi1>
    %169 = vector.broadcast %168 : vector<1x1xi1> to vector<1x16xi1>
    %170 = vector.broadcast %cst_52 : f32 to vector<1x16xf32>
    %171 = arith.select %169, %134, %170 : vector<1x16xi1>, vector<1x16xf32>
    %cst_53 = arith.constant 0.000000e+00 : f32
    %172 = vector.shape_cast %167 : vector<1x1xi1> to vector<1x1xi1>
    %173 = vector.broadcast %172 : vector<1x1xi1> to vector<1x16xi1>
    %174 = vector.broadcast %cst_53 : f32 to vector<1x16xf32>
    %175 = arith.select %173, %159, %174 : vector<1x16xi1>, vector<1x16xf32>
    %176 = vector.shape_cast %163 : vector<1x1xi1> to vector<1x1xi1>
    %177 = vector.broadcast %176 : vector<1x1xi1> to vector<1x16xi1>
    %178 = arith.select %177, %134, %90 : vector<1x16xi1>, vector<1x16xf32>
    %179 = vector.shape_cast %163 : vector<1x1xi1> to vector<1x1xi1>
    %180 = vector.broadcast %179 : vector<1x1xi1> to vector<1x16xi1>
    %181 = arith.select %180, %132, %93 : vector<1x16xi1>, vector<1x16xf32>
    %182 = vector.shape_cast %167 : vector<1x1xi1> to vector<1x1xi1>
    %183 = vector.broadcast %182 : vector<1x1xi1> to vector<1x16xi1>
    %184 = arith.select %183, %159, %96 : vector<1x16xi1>, vector<1x16xf32>
    %185 = vector.shape_cast %167 : vector<1x1xi1> to vector<1x1xi1>
    %186 = vector.broadcast %185 : vector<1x1xi1> to vector<1x16xi1>
    %187 = arith.select %186, %157, %99 : vector<1x16xi1>, vector<1x16xf32>
    %188 = tpu.concatenate %178, %184 in 1 : vector<1x16xf32>, vector<1x16xf32> -> vector<1x32xf32>
    %cst_54 = arith.constant dense<0.000000e+00> : vector<1x128xf32>
    %189 = tpu.matmul %188, %2, %cst_54 {dimension_numbers = #tpu.dot_dimension_numbers<[1], [0], [0], [1], [0, 0, 1, 1], [], []>} : vector<1x32xf32>, vector<32x128xf32>, vector<1x128xf32> -> vector<1x128xf32>
    %c0_55 = arith.constant 0 : index
    %c2 = arith.constant 2 : index
    %c0_56 = arith.constant 0 : index
    %190 = vector.load %arg8[%c0_55, %c2, %c0_56] : memref<1x8x128xf32, #tpu.memory_space<vmem>>, vector<1x1x64xf32>
    %191 = vector.shape_cast %190 : vector<1x1x64xf32> to vector<1x64xf32>
    %192 = vector.extract_strided_slice %189 {offsets = [0, 0], sizes = [1, 64], strides = [1, 1]} : vector<1x128xf32> to vector<1x64xf32>
    %193 = arith.addf %191, %192 : vector<1x64xf32>
    %c0_57 = arith.constant 0 : index
    %c5 = arith.constant 5 : index
    %c64_58 = arith.constant 64 : index
    %194 = vector.load %arg8[%c0_57, %c5, %c64_58] : memref<1x8x128xf32, #tpu.memory_space<vmem>>, vector<1x1x64xf32>
    %195 = vector.shape_cast %194 : vector<1x1x64xf32> to vector<1x64xf32>
    %196 = vector.extract_strided_slice %189 {offsets = [0, 64], sizes = [1, 64], strides = [1, 1]} : vector<1x128xf32> to vector<1x64xf32>
    %197 = arith.addf %195, %196 : vector<1x64xf32>
    %198 = vector.extract_strided_slice %193 {offsets = [0, 0], sizes = [1, 16], strides = [1, 1]} : vector<1x64xf32> to vector<1x16xf32>
    %199 = arith.negf %198 : vector<1x16xf32>
    %200 = math.exp %199 : vector<1x16xf32>
    %cst_59 = arith.constant 1.000000e+00 : f32
    %201 = vector.broadcast %cst_59 : f32 to vector<1x16xf32>
    %202 = arith.addf %201, %200 : vector<1x16xf32>
    %203 = arith.divf %201, %202 : vector<1x16xf32>
    %204 = vector.extract_strided_slice %193 {offsets = [0, 16], sizes = [1, 16], strides = [1, 1]} : vector<1x64xf32> to vector<1x16xf32>
    %205 = arith.negf %204 : vector<1x16xf32>
    %206 = math.exp %205 : vector<1x16xf32>
    %cst_60 = arith.constant 1.000000e+00 : f32
    %207 = vector.broadcast %cst_60 : f32 to vector<1x16xf32>
    %208 = arith.addf %207, %206 : vector<1x16xf32>
    %209 = arith.divf %207, %208 : vector<1x16xf32>
    %210 = vector.extract_strided_slice %193 {offsets = [0, 32], sizes = [1, 16], strides = [1, 1]} : vector<1x64xf32> to vector<1x16xf32>
    %211 = math.tanh %210 : vector<1x16xf32>
    %212 = vector.extract_strided_slice %193 {offsets = [0, 48], sizes = [1, 16], strides = [1, 1]} : vector<1x64xf32> to vector<1x16xf32>
    %213 = arith.negf %212 : vector<1x16xf32>
    %214 = math.exp %213 : vector<1x16xf32>
    %cst_61 = arith.constant 1.000000e+00 : f32
    %215 = vector.broadcast %cst_61 : f32 to vector<1x16xf32>
    %216 = arith.addf %215, %214 : vector<1x16xf32>
    %217 = arith.divf %215, %216 : vector<1x16xf32>
    %218 = arith.mulf %209, %181 : vector<1x16xf32>
    %219 = arith.mulf %203, %211 : vector<1x16xf32>
    %220 = arith.addf %218, %219 : vector<1x16xf32>
    %221 = math.tanh %220 : vector<1x16xf32>
    %222 = arith.mulf %217, %221 : vector<1x16xf32>
    %223 = vector.extract_strided_slice %197 {offsets = [0, 0], sizes = [1, 16], strides = [1, 1]} : vector<1x64xf32> to vector<1x16xf32>
    %224 = arith.negf %223 : vector<1x16xf32>
    %225 = math.exp %224 : vector<1x16xf32>
    %cst_62 = arith.constant 1.000000e+00 : f32
    %226 = vector.broadcast %cst_62 : f32 to vector<1x16xf32>
    %227 = arith.addf %226, %225 : vector<1x16xf32>
    %228 = arith.divf %226, %227 : vector<1x16xf32>
    %229 = vector.extract_strided_slice %197 {offsets = [0, 16], sizes = [1, 16], strides = [1, 1]} : vector<1x64xf32> to vector<1x16xf32>
    %230 = arith.negf %229 : vector<1x16xf32>
    %231 = math.exp %230 : vector<1x16xf32>
    %cst_63 = arith.constant 1.000000e+00 : f32
    %232 = vector.broadcast %cst_63 : f32 to vector<1x16xf32>
    %233 = arith.addf %232, %231 : vector<1x16xf32>
    %234 = arith.divf %232, %233 : vector<1x16xf32>
    %235 = vector.extract_strided_slice %197 {offsets = [0, 32], sizes = [1, 16], strides = [1, 1]} : vector<1x64xf32> to vector<1x16xf32>
    %236 = math.tanh %235 : vector<1x16xf32>
    %237 = vector.extract_strided_slice %197 {offsets = [0, 48], sizes = [1, 16], strides = [1, 1]} : vector<1x64xf32> to vector<1x16xf32>
    %238 = arith.negf %237 : vector<1x16xf32>
    %239 = math.exp %238 : vector<1x16xf32>
    %cst_64 = arith.constant 1.000000e+00 : f32
    %240 = vector.broadcast %cst_64 : f32 to vector<1x16xf32>
    %241 = arith.addf %240, %239 : vector<1x16xf32>
    %242 = arith.divf %240, %241 : vector<1x16xf32>
    %243 = arith.mulf %234, %187 : vector<1x16xf32>
    %244 = arith.mulf %228, %236 : vector<1x16xf32>
    %245 = arith.addf %243, %244 : vector<1x16xf32>
    %246 = math.tanh %245 : vector<1x16xf32>
    %247 = arith.mulf %242, %246 : vector<1x16xf32>
    %c0_65 = arith.constant 0 : index
    %c2_66 = arith.constant 2 : index
    %c0_67 = arith.constant 0 : index
    %248 = vector.load %arg1[%c0_65, %c2_66, %c0_67] : memref<1x8x1xf32, #tpu.memory_space<vmem>>, vector<1x1x1xf32>
    %249 = vector.shape_cast %248 : vector<1x1x1xf32> to vector<1x1xf32>
    %cst_68 = arith.constant 0.000000e+00 : f32
    %250 = vector.broadcast %cst_68 : f32 to vector<1x1xf32>
    %251 = arith.cmpf ogt, %249, %250 : vector<1x1xf32>
    %c0_69 = arith.constant 0 : index
    %c5_70 = arith.constant 5 : index
    %c0_71 = arith.constant 0 : index
    %252 = vector.load %arg1[%c0_69, %c5_70, %c0_71] : memref<1x8x1xf32, #tpu.memory_space<vmem>>, vector<1x1x1xf32>
    %253 = vector.shape_cast %252 : vector<1x1x1xf32> to vector<1x1xf32>
    %cst_72 = arith.constant 0.000000e+00 : f32
    %254 = vector.broadcast %cst_72 : f32 to vector<1x1xf32>
    %255 = arith.cmpf ogt, %253, %254 : vector<1x1xf32>
    %cst_73 = arith.constant 0.000000e+00 : f32
    %256 = vector.shape_cast %251 : vector<1x1xi1> to vector<1x1xi1>
    %257 = vector.broadcast %256 : vector<1x1xi1> to vector<1x16xi1>
    %258 = vector.broadcast %cst_73 : f32 to vector<1x16xf32>
    %259 = arith.select %257, %222, %258 : vector<1x16xi1>, vector<1x16xf32>
    %cst_74 = arith.constant 0.000000e+00 : f32
    %260 = vector.shape_cast %255 : vector<1x1xi1> to vector<1x1xi1>
    %261 = vector.broadcast %260 : vector<1x1xi1> to vector<1x16xi1>
    %262 = vector.broadcast %cst_74 : f32 to vector<1x16xf32>
    %263 = arith.select %261, %247, %262 : vector<1x16xi1>, vector<1x16xf32>
    %264 = vector.shape_cast %251 : vector<1x1xi1> to vector<1x1xi1>
    %265 = vector.broadcast %264 : vector<1x1xi1> to vector<1x16xi1>
    %266 = arith.select %265, %222, %178 : vector<1x16xi1>, vector<1x16xf32>
    %267 = vector.shape_cast %251 : vector<1x1xi1> to vector<1x1xi1>
    %268 = vector.broadcast %267 : vector<1x1xi1> to vector<1x16xi1>
    %269 = arith.select %268, %220, %181 : vector<1x16xi1>, vector<1x16xf32>
    %270 = vector.shape_cast %255 : vector<1x1xi1> to vector<1x1xi1>
    %271 = vector.broadcast %270 : vector<1x1xi1> to vector<1x16xi1>
    %272 = arith.select %271, %247, %184 : vector<1x16xi1>, vector<1x16xf32>
    %273 = vector.shape_cast %255 : vector<1x1xi1> to vector<1x1xi1>
    %274 = vector.broadcast %273 : vector<1x1xi1> to vector<1x16xi1>
    %275 = arith.select %274, %245, %187 : vector<1x16xi1>, vector<1x16xf32>
    %276 = tpu.concatenate %266, %272 in 1 : vector<1x16xf32>, vector<1x16xf32> -> vector<1x32xf32>
    %cst_75 = arith.constant dense<0.000000e+00> : vector<1x128xf32>
    %277 = tpu.matmul %276, %2, %cst_75 {dimension_numbers = #tpu.dot_dimension_numbers<[1], [0], [0], [1], [0, 0, 1, 1], [], []>} : vector<1x32xf32>, vector<32x128xf32>, vector<1x128xf32> -> vector<1x128xf32>
    %c0_76 = arith.constant 0 : index
    %c3 = arith.constant 3 : index
    %c0_77 = arith.constant 0 : index
    %278 = vector.load %arg8[%c0_76, %c3, %c0_77] : memref<1x8x128xf32, #tpu.memory_space<vmem>>, vector<1x1x64xf32>
    %279 = vector.shape_cast %278 : vector<1x1x64xf32> to vector<1x64xf32>
    %280 = vector.extract_strided_slice %277 {offsets = [0, 0], sizes = [1, 64], strides = [1, 1]} : vector<1x128xf32> to vector<1x64xf32>
    %281 = arith.addf %279, %280 : vector<1x64xf32>
    %c0_78 = arith.constant 0 : index
    %c4 = arith.constant 4 : index
    %c64_79 = arith.constant 64 : index
    %282 = vector.load %arg8[%c0_78, %c4, %c64_79] : memref<1x8x128xf32, #tpu.memory_space<vmem>>, vector<1x1x64xf32>
    %283 = vector.shape_cast %282 : vector<1x1x64xf32> to vector<1x64xf32>
    %284 = vector.extract_strided_slice %277 {offsets = [0, 64], sizes = [1, 64], strides = [1, 1]} : vector<1x128xf32> to vector<1x64xf32>
    %285 = arith.addf %283, %284 : vector<1x64xf32>
    %286 = vector.extract_strided_slice %281 {offsets = [0, 0], sizes = [1, 16], strides = [1, 1]} : vector<1x64xf32> to vector<1x16xf32>
    %287 = arith.negf %286 : vector<1x16xf32>
    %288 = math.exp %287 : vector<1x16xf32>
    %cst_80 = arith.constant 1.000000e+00 : f32
    %289 = vector.broadcast %cst_80 : f32 to vector<1x16xf32>
    %290 = arith.addf %289, %288 : vector<1x16xf32>
    %291 = arith.divf %289, %290 : vector<1x16xf32>
    %292 = vector.extract_strided_slice %281 {offsets = [0, 16], sizes = [1, 16], strides = [1, 1]} : vector<1x64xf32> to vector<1x16xf32>
    %293 = arith.negf %292 : vector<1x16xf32>
    %294 = math.exp %293 : vector<1x16xf32>
    %cst_81 = arith.constant 1.000000e+00 : f32
    %295 = vector.broadcast %cst_81 : f32 to vector<1x16xf32>
    %296 = arith.addf %295, %294 : vector<1x16xf32>
    %297 = arith.divf %295, %296 : vector<1x16xf32>
    %298 = vector.extract_strided_slice %281 {offsets = [0, 32], sizes = [1, 16], strides = [1, 1]} : vector<1x64xf32> to vector<1x16xf32>
    %299 = math.tanh %298 : vector<1x16xf32>
    %300 = vector.extract_strided_slice %281 {offsets = [0, 48], sizes = [1, 16], strides = [1, 1]} : vector<1x64xf32> to vector<1x16xf32>
    %301 = arith.negf %300 : vector<1x16xf32>
    %302 = math.exp %301 : vector<1x16xf32>
    %cst_82 = arith.constant 1.000000e+00 : f32
    %303 = vector.broadcast %cst_82 : f32 to vector<1x16xf32>
    %304 = arith.addf %303, %302 : vector<1x16xf32>
    %305 = arith.divf %303, %304 : vector<1x16xf32>
    %306 = arith.mulf %297, %269 : vector<1x16xf32>
    %307 = arith.mulf %291, %299 : vector<1x16xf32>
    %308 = arith.addf %306, %307 : vector<1x16xf32>
    %309 = math.tanh %308 : vector<1x16xf32>
    %310 = arith.mulf %305, %309 : vector<1x16xf32>
    %311 = vector.extract_strided_slice %285 {offsets = [0, 0], sizes = [1, 16], strides = [1, 1]} : vector<1x64xf32> to vector<1x16xf32>
    %312 = arith.negf %311 : vector<1x16xf32>
    %313 = math.exp %312 : vector<1x16xf32>
    %cst_83 = arith.constant 1.000000e+00 : f32
    %314 = vector.broadcast %cst_83 : f32 to vector<1x16xf32>
    %315 = arith.addf %314, %313 : vector<1x16xf32>
    %316 = arith.divf %314, %315 : vector<1x16xf32>
    %317 = vector.extract_strided_slice %285 {offsets = [0, 16], sizes = [1, 16], strides = [1, 1]} : vector<1x64xf32> to vector<1x16xf32>
    %318 = arith.negf %317 : vector<1x16xf32>
    %319 = math.exp %318 : vector<1x16xf32>
    %cst_84 = arith.constant 1.000000e+00 : f32
    %320 = vector.broadcast %cst_84 : f32 to vector<1x16xf32>
    %321 = arith.addf %320, %319 : vector<1x16xf32>
    %322 = arith.divf %320, %321 : vector<1x16xf32>
    %323 = vector.extract_strided_slice %285 {offsets = [0, 32], sizes = [1, 16], strides = [1, 1]} : vector<1x64xf32> to vector<1x16xf32>
    %324 = math.tanh %323 : vector<1x16xf32>
    %325 = vector.extract_strided_slice %285 {offsets = [0, 48], sizes = [1, 16], strides = [1, 1]} : vector<1x64xf32> to vector<1x16xf32>
    %326 = arith.negf %325 : vector<1x16xf32>
    %327 = math.exp %326 : vector<1x16xf32>
    %cst_85 = arith.constant 1.000000e+00 : f32
    %328 = vector.broadcast %cst_85 : f32 to vector<1x16xf32>
    %329 = arith.addf %328, %327 : vector<1x16xf32>
    %330 = arith.divf %328, %329 : vector<1x16xf32>
    %331 = arith.mulf %322, %275 : vector<1x16xf32>
    %332 = arith.mulf %316, %324 : vector<1x16xf32>
    %333 = arith.addf %331, %332 : vector<1x16xf32>
    %334 = math.tanh %333 : vector<1x16xf32>
    %335 = arith.mulf %330, %334 : vector<1x16xf32>
    %c0_86 = arith.constant 0 : index
    %c3_87 = arith.constant 3 : index
    %c0_88 = arith.constant 0 : index
    %336 = vector.load %arg1[%c0_86, %c3_87, %c0_88] : memref<1x8x1xf32, #tpu.memory_space<vmem>>, vector<1x1x1xf32>
    %337 = vector.shape_cast %336 : vector<1x1x1xf32> to vector<1x1xf32>
    %cst_89 = arith.constant 0.000000e+00 : f32
    %338 = vector.broadcast %cst_89 : f32 to vector<1x1xf32>
    %339 = arith.cmpf ogt, %337, %338 : vector<1x1xf32>
    %c0_90 = arith.constant 0 : index
    %c4_91 = arith.constant 4 : index
    %c0_92 = arith.constant 0 : index
    %340 = vector.load %arg1[%c0_90, %c4_91, %c0_92] : memref<1x8x1xf32, #tpu.memory_space<vmem>>, vector<1x1x1xf32>
    %341 = vector.shape_cast %340 : vector<1x1x1xf32> to vector<1x1xf32>
    %cst_93 = arith.constant 0.000000e+00 : f32
    %342 = vector.broadcast %cst_93 : f32 to vector<1x1xf32>
    %343 = arith.cmpf ogt, %341, %342 : vector<1x1xf32>
    %cst_94 = arith.constant 0.000000e+00 : f32
    %344 = vector.shape_cast %339 : vector<1x1xi1> to vector<1x1xi1>
    %345 = vector.broadcast %344 : vector<1x1xi1> to vector<1x16xi1>
    %346 = vector.broadcast %cst_94 : f32 to vector<1x16xf32>
    %347 = arith.select %345, %310, %346 : vector<1x16xi1>, vector<1x16xf32>
    %cst_95 = arith.constant 0.000000e+00 : f32
    %348 = vector.shape_cast %343 : vector<1x1xi1> to vector<1x1xi1>
    %349 = vector.broadcast %348 : vector<1x1xi1> to vector<1x16xi1>
    %350 = vector.broadcast %cst_95 : f32 to vector<1x16xf32>
    %351 = arith.select %349, %335, %350 : vector<1x16xi1>, vector<1x16xf32>
    %352 = vector.shape_cast %339 : vector<1x1xi1> to vector<1x1xi1>
    %353 = vector.broadcast %352 : vector<1x1xi1> to vector<1x16xi1>
    %354 = arith.select %353, %310, %266 : vector<1x16xi1>, vector<1x16xf32>
    %355 = vector.shape_cast %339 : vector<1x1xi1> to vector<1x1xi1>
    %356 = vector.broadcast %355 : vector<1x1xi1> to vector<1x16xi1>
    %357 = arith.select %356, %308, %269 : vector<1x16xi1>, vector<1x16xf32>
    %358 = vector.shape_cast %343 : vector<1x1xi1> to vector<1x1xi1>
    %359 = vector.broadcast %358 : vector<1x1xi1> to vector<1x16xi1>
    %360 = arith.select %359, %335, %272 : vector<1x16xi1>, vector<1x16xf32>
    %361 = vector.shape_cast %343 : vector<1x1xi1> to vector<1x1xi1>
    %362 = vector.broadcast %361 : vector<1x1xi1> to vector<1x16xi1>
    %363 = arith.select %362, %333, %275 : vector<1x16xi1>, vector<1x16xf32>
    %364 = tpu.concatenate %354, %360 in 1 : vector<1x16xf32>, vector<1x16xf32> -> vector<1x32xf32>
    %cst_96 = arith.constant dense<0.000000e+00> : vector<1x128xf32>
    %365 = tpu.matmul %364, %2, %cst_96 {dimension_numbers = #tpu.dot_dimension_numbers<[1], [0], [0], [1], [0, 0, 1, 1], [], []>} : vector<1x32xf32>, vector<32x128xf32>, vector<1x128xf32> -> vector<1x128xf32>
    %c0_97 = arith.constant 0 : index
    %c4_98 = arith.constant 4 : index
    %c0_99 = arith.constant 0 : index
    %366 = vector.load %arg8[%c0_97, %c4_98, %c0_99] : memref<1x8x128xf32, #tpu.memory_space<vmem>>, vector<1x1x64xf32>
    %367 = vector.shape_cast %366 : vector<1x1x64xf32> to vector<1x64xf32>
    %368 = vector.extract_strided_slice %365 {offsets = [0, 0], sizes = [1, 64], strides = [1, 1]} : vector<1x128xf32> to vector<1x64xf32>
    %369 = arith.addf %367, %368 : vector<1x64xf32>
    %c0_100 = arith.constant 0 : index
    %c3_101 = arith.constant 3 : index
    %c64_102 = arith.constant 64 : index
    %370 = vector.load %arg8[%c0_100, %c3_101, %c64_102] : memref<1x8x128xf32, #tpu.memory_space<vmem>>, vector<1x1x64xf32>
    %371 = vector.shape_cast %370 : vector<1x1x64xf32> to vector<1x64xf32>
    %372 = vector.extract_strided_slice %365 {offsets = [0, 64], sizes = [1, 64], strides = [1, 1]} : vector<1x128xf32> to vector<1x64xf32>
    %373 = arith.addf %371, %372 : vector<1x64xf32>
    %374 = vector.extract_strided_slice %369 {offsets = [0, 0], sizes = [1, 16], strides = [1, 1]} : vector<1x64xf32> to vector<1x16xf32>
    %375 = arith.negf %374 : vector<1x16xf32>
    %376 = math.exp %375 : vector<1x16xf32>
    %cst_103 = arith.constant 1.000000e+00 : f32
    %377 = vector.broadcast %cst_103 : f32 to vector<1x16xf32>
    %378 = arith.addf %377, %376 : vector<1x16xf32>
    %379 = arith.divf %377, %378 : vector<1x16xf32>
    %380 = vector.extract_strided_slice %369 {offsets = [0, 16], sizes = [1, 16], strides = [1, 1]} : vector<1x64xf32> to vector<1x16xf32>
    %381 = arith.negf %380 : vector<1x16xf32>
    %382 = math.exp %381 : vector<1x16xf32>
    %cst_104 = arith.constant 1.000000e+00 : f32
    %383 = vector.broadcast %cst_104 : f32 to vector<1x16xf32>
    %384 = arith.addf %383, %382 : vector<1x16xf32>
    %385 = arith.divf %383, %384 : vector<1x16xf32>
    %386 = vector.extract_strided_slice %369 {offsets = [0, 32], sizes = [1, 16], strides = [1, 1]} : vector<1x64xf32> to vector<1x16xf32>
    %387 = math.tanh %386 : vector<1x16xf32>
    %388 = vector.extract_strided_slice %369 {offsets = [0, 48], sizes = [1, 16], strides = [1, 1]} : vector<1x64xf32> to vector<1x16xf32>
    %389 = arith.negf %388 : vector<1x16xf32>
    %390 = math.exp %389 : vector<1x16xf32>
    %cst_105 = arith.constant 1.000000e+00 : f32
    %391 = vector.broadcast %cst_105 : f32 to vector<1x16xf32>
    %392 = arith.addf %391, %390 : vector<1x16xf32>
    %393 = arith.divf %391, %392 : vector<1x16xf32>
    %394 = arith.mulf %385, %357 : vector<1x16xf32>
    %395 = arith.mulf %379, %387 : vector<1x16xf32>
    %396 = arith.addf %394, %395 : vector<1x16xf32>
    %397 = math.tanh %396 : vector<1x16xf32>
    %398 = arith.mulf %393, %397 : vector<1x16xf32>
    %399 = vector.extract_strided_slice %373 {offsets = [0, 0], sizes = [1, 16], strides = [1, 1]} : vector<1x64xf32> to vector<1x16xf32>
    %400 = arith.negf %399 : vector<1x16xf32>
    %401 = math.exp %400 : vector<1x16xf32>
    %cst_106 = arith.constant 1.000000e+00 : f32
    %402 = vector.broadcast %cst_106 : f32 to vector<1x16xf32>
    %403 = arith.addf %402, %401 : vector<1x16xf32>
    %404 = arith.divf %402, %403 : vector<1x16xf32>
    %405 = vector.extract_strided_slice %373 {offsets = [0, 16], sizes = [1, 16], strides = [1, 1]} : vector<1x64xf32> to vector<1x16xf32>
    %406 = arith.negf %405 : vector<1x16xf32>
    %407 = math.exp %406 : vector<1x16xf32>
    %cst_107 = arith.constant 1.000000e+00 : f32
    %408 = vector.broadcast %cst_107 : f32 to vector<1x16xf32>
    %409 = arith.addf %408, %407 : vector<1x16xf32>
    %410 = arith.divf %408, %409 : vector<1x16xf32>
    %411 = vector.extract_strided_slice %373 {offsets = [0, 32], sizes = [1, 16], strides = [1, 1]} : vector<1x64xf32> to vector<1x16xf32>
    %412 = math.tanh %411 : vector<1x16xf32>
    %413 = vector.extract_strided_slice %373 {offsets = [0, 48], sizes = [1, 16], strides = [1, 1]} : vector<1x64xf32> to vector<1x16xf32>
    %414 = arith.negf %413 : vector<1x16xf32>
    %415 = math.exp %414 : vector<1x16xf32>
    %cst_108 = arith.constant 1.000000e+00 : f32
    %416 = vector.broadcast %cst_108 : f32 to vector<1x16xf32>
    %417 = arith.addf %416, %415 : vector<1x16xf32>
    %418 = arith.divf %416, %417 : vector<1x16xf32>
    %419 = arith.mulf %410, %363 : vector<1x16xf32>
    %420 = arith.mulf %404, %412 : vector<1x16xf32>
    %421 = arith.addf %419, %420 : vector<1x16xf32>
    %422 = math.tanh %421 : vector<1x16xf32>
    %423 = arith.mulf %418, %422 : vector<1x16xf32>
    %c0_109 = arith.constant 0 : index
    %c4_110 = arith.constant 4 : index
    %c0_111 = arith.constant 0 : index
    %424 = vector.load %arg1[%c0_109, %c4_110, %c0_111] : memref<1x8x1xf32, #tpu.memory_space<vmem>>, vector<1x1x1xf32>
    %425 = vector.shape_cast %424 : vector<1x1x1xf32> to vector<1x1xf32>
    %cst_112 = arith.constant 0.000000e+00 : f32
    %426 = vector.broadcast %cst_112 : f32 to vector<1x1xf32>
    %427 = arith.cmpf ogt, %425, %426 : vector<1x1xf32>
    %c0_113 = arith.constant 0 : index
    %c3_114 = arith.constant 3 : index
    %c0_115 = arith.constant 0 : index
    %428 = vector.load %arg1[%c0_113, %c3_114, %c0_115] : memref<1x8x1xf32, #tpu.memory_space<vmem>>, vector<1x1x1xf32>
    %429 = vector.shape_cast %428 : vector<1x1x1xf32> to vector<1x1xf32>
    %cst_116 = arith.constant 0.000000e+00 : f32
    %430 = vector.broadcast %cst_116 : f32 to vector<1x1xf32>
    %431 = arith.cmpf ogt, %429, %430 : vector<1x1xf32>
    %cst_117 = arith.constant 0.000000e+00 : f32
    %432 = vector.shape_cast %427 : vector<1x1xi1> to vector<1x1xi1>
    %433 = vector.broadcast %432 : vector<1x1xi1> to vector<1x16xi1>
    %434 = vector.broadcast %cst_117 : f32 to vector<1x16xf32>
    %435 = arith.select %433, %398, %434 : vector<1x16xi1>, vector<1x16xf32>
    %cst_118 = arith.constant 0.000000e+00 : f32
    %436 = vector.shape_cast %431 : vector<1x1xi1> to vector<1x1xi1>
    %437 = vector.broadcast %436 : vector<1x1xi1> to vector<1x16xi1>
    %438 = vector.broadcast %cst_118 : f32 to vector<1x16xf32>
    %439 = arith.select %437, %423, %438 : vector<1x16xi1>, vector<1x16xf32>
    %440 = vector.shape_cast %427 : vector<1x1xi1> to vector<1x1xi1>
    %441 = vector.broadcast %440 : vector<1x1xi1> to vector<1x16xi1>
    %442 = arith.select %441, %398, %354 : vector<1x16xi1>, vector<1x16xf32>
    %443 = vector.shape_cast %427 : vector<1x1xi1> to vector<1x1xi1>
    %444 = vector.broadcast %443 : vector<1x1xi1> to vector<1x16xi1>
    %445 = arith.select %444, %396, %357 : vector<1x16xi1>, vector<1x16xf32>
    %446 = vector.shape_cast %431 : vector<1x1xi1> to vector<1x1xi1>
    %447 = vector.broadcast %446 : vector<1x1xi1> to vector<1x16xi1>
    %448 = arith.select %447, %423, %360 : vector<1x16xi1>, vector<1x16xf32>
    %449 = vector.shape_cast %431 : vector<1x1xi1> to vector<1x1xi1>
    %450 = vector.broadcast %449 : vector<1x1xi1> to vector<1x16xi1>
    %451 = arith.select %450, %421, %363 : vector<1x16xi1>, vector<1x16xf32>
    %452 = tpu.concatenate %442, %448 in 1 : vector<1x16xf32>, vector<1x16xf32> -> vector<1x32xf32>
    %cst_119 = arith.constant dense<0.000000e+00> : vector<1x128xf32>
    %453 = tpu.matmul %452, %2, %cst_119 {dimension_numbers = #tpu.dot_dimension_numbers<[1], [0], [0], [1], [0, 0, 1, 1], [], []>} : vector<1x32xf32>, vector<32x128xf32>, vector<1x128xf32> -> vector<1x128xf32>
    %c0_120 = arith.constant 0 : index
    %c5_121 = arith.constant 5 : index
    %c0_122 = arith.constant 0 : index
    %454 = vector.load %arg8[%c0_120, %c5_121, %c0_122] : memref<1x8x128xf32, #tpu.memory_space<vmem>>, vector<1x1x64xf32>
    %455 = vector.shape_cast %454 : vector<1x1x64xf32> to vector<1x64xf32>
    %456 = vector.extract_strided_slice %453 {offsets = [0, 0], sizes = [1, 64], strides = [1, 1]} : vector<1x128xf32> to vector<1x64xf32>
    %457 = arith.addf %455, %456 : vector<1x64xf32>
    %c0_123 = arith.constant 0 : index
    %c2_124 = arith.constant 2 : index
    %c64_125 = arith.constant 64 : index
    %458 = vector.load %arg8[%c0_123, %c2_124, %c64_125] : memref<1x8x128xf32, #tpu.memory_space<vmem>>, vector<1x1x64xf32>
    %459 = vector.shape_cast %458 : vector<1x1x64xf32> to vector<1x64xf32>
    %460 = vector.extract_strided_slice %453 {offsets = [0, 64], sizes = [1, 64], strides = [1, 1]} : vector<1x128xf32> to vector<1x64xf32>
    %461 = arith.addf %459, %460 : vector<1x64xf32>
    %462 = vector.extract_strided_slice %457 {offsets = [0, 0], sizes = [1, 16], strides = [1, 1]} : vector<1x64xf32> to vector<1x16xf32>
    %463 = arith.negf %462 : vector<1x16xf32>
    %464 = math.exp %463 : vector<1x16xf32>
    %cst_126 = arith.constant 1.000000e+00 : f32
    %465 = vector.broadcast %cst_126 : f32 to vector<1x16xf32>
    %466 = arith.addf %465, %464 : vector<1x16xf32>
    %467 = arith.divf %465, %466 : vector<1x16xf32>
    %468 = vector.extract_strided_slice %457 {offsets = [0, 16], sizes = [1, 16], strides = [1, 1]} : vector<1x64xf32> to vector<1x16xf32>
    %469 = arith.negf %468 : vector<1x16xf32>
    %470 = math.exp %469 : vector<1x16xf32>
    %cst_127 = arith.constant 1.000000e+00 : f32
    %471 = vector.broadcast %cst_127 : f32 to vector<1x16xf32>
    %472 = arith.addf %471, %470 : vector<1x16xf32>
    %473 = arith.divf %471, %472 : vector<1x16xf32>
    %474 = vector.extract_strided_slice %457 {offsets = [0, 32], sizes = [1, 16], strides = [1, 1]} : vector<1x64xf32> to vector<1x16xf32>
    %475 = math.tanh %474 : vector<1x16xf32>
    %476 = vector.extract_strided_slice %457 {offsets = [0, 48], sizes = [1, 16], strides = [1, 1]} : vector<1x64xf32> to vector<1x16xf32>
    %477 = arith.negf %476 : vector<1x16xf32>
    %478 = math.exp %477 : vector<1x16xf32>
    %cst_128 = arith.constant 1.000000e+00 : f32
    %479 = vector.broadcast %cst_128 : f32 to vector<1x16xf32>
    %480 = arith.addf %479, %478 : vector<1x16xf32>
    %481 = arith.divf %479, %480 : vector<1x16xf32>
    %482 = arith.mulf %473, %445 : vector<1x16xf32>
    %483 = arith.mulf %467, %475 : vector<1x16xf32>
    %484 = arith.addf %482, %483 : vector<1x16xf32>
    %485 = math.tanh %484 : vector<1x16xf32>
    %486 = arith.mulf %481, %485 : vector<1x16xf32>
    %487 = vector.extract_strided_slice %461 {offsets = [0, 0], sizes = [1, 16], strides = [1, 1]} : vector<1x64xf32> to vector<1x16xf32>
    %488 = arith.negf %487 : vector<1x16xf32>
    %489 = math.exp %488 : vector<1x16xf32>
    %cst_129 = arith.constant 1.000000e+00 : f32
    %490 = vector.broadcast %cst_129 : f32 to vector<1x16xf32>
    %491 = arith.addf %490, %489 : vector<1x16xf32>
    %492 = arith.divf %490, %491 : vector<1x16xf32>
    %493 = vector.extract_strided_slice %461 {offsets = [0, 16], sizes = [1, 16], strides = [1, 1]} : vector<1x64xf32> to vector<1x16xf32>
    %494 = arith.negf %493 : vector<1x16xf32>
    %495 = math.exp %494 : vector<1x16xf32>
    %cst_130 = arith.constant 1.000000e+00 : f32
    %496 = vector.broadcast %cst_130 : f32 to vector<1x16xf32>
    %497 = arith.addf %496, %495 : vector<1x16xf32>
    %498 = arith.divf %496, %497 : vector<1x16xf32>
    %499 = vector.extract_strided_slice %461 {offsets = [0, 32], sizes = [1, 16], strides = [1, 1]} : vector<1x64xf32> to vector<1x16xf32>
    %500 = math.tanh %499 : vector<1x16xf32>
    %501 = vector.extract_strided_slice %461 {offsets = [0, 48], sizes = [1, 16], strides = [1, 1]} : vector<1x64xf32> to vector<1x16xf32>
    %502 = arith.negf %501 : vector<1x16xf32>
    %503 = math.exp %502 : vector<1x16xf32>
    %cst_131 = arith.constant 1.000000e+00 : f32
    %504 = vector.broadcast %cst_131 : f32 to vector<1x16xf32>
    %505 = arith.addf %504, %503 : vector<1x16xf32>
    %506 = arith.divf %504, %505 : vector<1x16xf32>
    %507 = arith.mulf %498, %451 : vector<1x16xf32>
    %508 = arith.mulf %492, %500 : vector<1x16xf32>
    %509 = arith.addf %507, %508 : vector<1x16xf32>
    %510 = math.tanh %509 : vector<1x16xf32>
    %511 = arith.mulf %506, %510 : vector<1x16xf32>
    %c0_132 = arith.constant 0 : index
    %c5_133 = arith.constant 5 : index
    %c0_134 = arith.constant 0 : index
    %512 = vector.load %arg1[%c0_132, %c5_133, %c0_134] : memref<1x8x1xf32, #tpu.memory_space<vmem>>, vector<1x1x1xf32>
    %513 = vector.shape_cast %512 : vector<1x1x1xf32> to vector<1x1xf32>
    %cst_135 = arith.constant 0.000000e+00 : f32
    %514 = vector.broadcast %cst_135 : f32 to vector<1x1xf32>
    %515 = arith.cmpf ogt, %513, %514 : vector<1x1xf32>
    %c0_136 = arith.constant 0 : index
    %c2_137 = arith.constant 2 : index
    %c0_138 = arith.constant 0 : index
    %516 = vector.load %arg1[%c0_136, %c2_137, %c0_138] : memref<1x8x1xf32, #tpu.memory_space<vmem>>, vector<1x1x1xf32>
    %517 = vector.shape_cast %516 : vector<1x1x1xf32> to vector<1x1xf32>
    %cst_139 = arith.constant 0.000000e+00 : f32
    %518 = vector.broadcast %cst_139 : f32 to vector<1x1xf32>
    %519 = arith.cmpf ogt, %517, %518 : vector<1x1xf32>
    %cst_140 = arith.constant 0.000000e+00 : f32
    %520 = vector.shape_cast %515 : vector<1x1xi1> to vector<1x1xi1>
    %521 = vector.broadcast %520 : vector<1x1xi1> to vector<1x16xi1>
    %522 = vector.broadcast %cst_140 : f32 to vector<1x16xf32>
    %523 = arith.select %521, %486, %522 : vector<1x16xi1>, vector<1x16xf32>
    %cst_141 = arith.constant 0.000000e+00 : f32
    %524 = vector.shape_cast %519 : vector<1x1xi1> to vector<1x1xi1>
    %525 = vector.broadcast %524 : vector<1x1xi1> to vector<1x16xi1>
    %526 = vector.broadcast %cst_141 : f32 to vector<1x16xf32>
    %527 = arith.select %525, %511, %526 : vector<1x16xi1>, vector<1x16xf32>
    %528 = vector.shape_cast %515 : vector<1x1xi1> to vector<1x1xi1>
    %529 = vector.broadcast %528 : vector<1x1xi1> to vector<1x16xi1>
    %530 = arith.select %529, %486, %442 : vector<1x16xi1>, vector<1x16xf32>
    %531 = vector.shape_cast %515 : vector<1x1xi1> to vector<1x1xi1>
    %532 = vector.broadcast %531 : vector<1x1xi1> to vector<1x16xi1>
    %533 = arith.select %532, %484, %445 : vector<1x16xi1>, vector<1x16xf32>
    %534 = vector.shape_cast %519 : vector<1x1xi1> to vector<1x1xi1>
    %535 = vector.broadcast %534 : vector<1x1xi1> to vector<1x16xi1>
    %536 = arith.select %535, %511, %448 : vector<1x16xi1>, vector<1x16xf32>
    %537 = vector.shape_cast %519 : vector<1x1xi1> to vector<1x1xi1>
    %538 = vector.broadcast %537 : vector<1x1xi1> to vector<1x16xi1>
    %539 = arith.select %538, %509, %451 : vector<1x16xi1>, vector<1x16xf32>
    %540 = tpu.concatenate %530, %536 in 1 : vector<1x16xf32>, vector<1x16xf32> -> vector<1x32xf32>
    %cst_142 = arith.constant dense<0.000000e+00> : vector<1x128xf32>
    %541 = tpu.matmul %540, %2, %cst_142 {dimension_numbers = #tpu.dot_dimension_numbers<[1], [0], [0], [1], [0, 0, 1, 1], [], []>} : vector<1x32xf32>, vector<32x128xf32>, vector<1x128xf32> -> vector<1x128xf32>
    %c0_143 = arith.constant 0 : index
    %c6_144 = arith.constant 6 : index
    %c0_145 = arith.constant 0 : index
    %542 = vector.load %arg8[%c0_143, %c6_144, %c0_145] : memref<1x8x128xf32, #tpu.memory_space<vmem>>, vector<1x1x64xf32>
    %543 = vector.shape_cast %542 : vector<1x1x64xf32> to vector<1x64xf32>
    %544 = vector.extract_strided_slice %541 {offsets = [0, 0], sizes = [1, 64], strides = [1, 1]} : vector<1x128xf32> to vector<1x64xf32>
    %545 = arith.addf %543, %544 : vector<1x64xf32>
    %c0_146 = arith.constant 0 : index
    %c1_147 = arith.constant 1 : index
    %c64_148 = arith.constant 64 : index
    %546 = vector.load %arg8[%c0_146, %c1_147, %c64_148] : memref<1x8x128xf32, #tpu.memory_space<vmem>>, vector<1x1x64xf32>
    %547 = vector.shape_cast %546 : vector<1x1x64xf32> to vector<1x64xf32>
    %548 = vector.extract_strided_slice %541 {offsets = [0, 64], sizes = [1, 64], strides = [1, 1]} : vector<1x128xf32> to vector<1x64xf32>
    %549 = arith.addf %547, %548 : vector<1x64xf32>
    %550 = vector.extract_strided_slice %545 {offsets = [0, 0], sizes = [1, 16], strides = [1, 1]} : vector<1x64xf32> to vector<1x16xf32>
    %551 = arith.negf %550 : vector<1x16xf32>
    %552 = math.exp %551 : vector<1x16xf32>
    %cst_149 = arith.constant 1.000000e+00 : f32
    %553 = vector.broadcast %cst_149 : f32 to vector<1x16xf32>
    %554 = arith.addf %553, %552 : vector<1x16xf32>
    %555 = arith.divf %553, %554 : vector<1x16xf32>
    %556 = vector.extract_strided_slice %545 {offsets = [0, 16], sizes = [1, 16], strides = [1, 1]} : vector<1x64xf32> to vector<1x16xf32>
    %557 = arith.negf %556 : vector<1x16xf32>
    %558 = math.exp %557 : vector<1x16xf32>
    %cst_150 = arith.constant 1.000000e+00 : f32
    %559 = vector.broadcast %cst_150 : f32 to vector<1x16xf32>
    %560 = arith.addf %559, %558 : vector<1x16xf32>
    %561 = arith.divf %559, %560 : vector<1x16xf32>
    %562 = vector.extract_strided_slice %545 {offsets = [0, 32], sizes = [1, 16], strides = [1, 1]} : vector<1x64xf32> to vector<1x16xf32>
    %563 = math.tanh %562 : vector<1x16xf32>
    %564 = vector.extract_strided_slice %545 {offsets = [0, 48], sizes = [1, 16], strides = [1, 1]} : vector<1x64xf32> to vector<1x16xf32>
    %565 = arith.negf %564 : vector<1x16xf32>
    %566 = math.exp %565 : vector<1x16xf32>
    %cst_151 = arith.constant 1.000000e+00 : f32
    %567 = vector.broadcast %cst_151 : f32 to vector<1x16xf32>
    %568 = arith.addf %567, %566 : vector<1x16xf32>
    %569 = arith.divf %567, %568 : vector<1x16xf32>
    %570 = arith.mulf %561, %533 : vector<1x16xf32>
    %571 = arith.mulf %555, %563 : vector<1x16xf32>
    %572 = arith.addf %570, %571 : vector<1x16xf32>
    %573 = math.tanh %572 : vector<1x16xf32>
    %574 = arith.mulf %569, %573 : vector<1x16xf32>
    %575 = vector.extract_strided_slice %549 {offsets = [0, 0], sizes = [1, 16], strides = [1, 1]} : vector<1x64xf32> to vector<1x16xf32>
    %576 = arith.negf %575 : vector<1x16xf32>
    %577 = math.exp %576 : vector<1x16xf32>
    %cst_152 = arith.constant 1.000000e+00 : f32
    %578 = vector.broadcast %cst_152 : f32 to vector<1x16xf32>
    %579 = arith.addf %578, %577 : vector<1x16xf32>
    %580 = arith.divf %578, %579 : vector<1x16xf32>
    %581 = vector.extract_strided_slice %549 {offsets = [0, 16], sizes = [1, 16], strides = [1, 1]} : vector<1x64xf32> to vector<1x16xf32>
    %582 = arith.negf %581 : vector<1x16xf32>
    %583 = math.exp %582 : vector<1x16xf32>
    %cst_153 = arith.constant 1.000000e+00 : f32
    %584 = vector.broadcast %cst_153 : f32 to vector<1x16xf32>
    %585 = arith.addf %584, %583 : vector<1x16xf32>
    %586 = arith.divf %584, %585 : vector<1x16xf32>
    %587 = vector.extract_strided_slice %549 {offsets = [0, 32], sizes = [1, 16], strides = [1, 1]} : vector<1x64xf32> to vector<1x16xf32>
    %588 = math.tanh %587 : vector<1x16xf32>
    %589 = vector.extract_strided_slice %549 {offsets = [0, 48], sizes = [1, 16], strides = [1, 1]} : vector<1x64xf32> to vector<1x16xf32>
    %590 = arith.negf %589 : vector<1x16xf32>
    %591 = math.exp %590 : vector<1x16xf32>
    %cst_154 = arith.constant 1.000000e+00 : f32
    %592 = vector.broadcast %cst_154 : f32 to vector<1x16xf32>
    %593 = arith.addf %592, %591 : vector<1x16xf32>
    %594 = arith.divf %592, %593 : vector<1x16xf32>
    %595 = arith.mulf %586, %539 : vector<1x16xf32>
    %596 = arith.mulf %580, %588 : vector<1x16xf32>
    %597 = arith.addf %595, %596 : vector<1x16xf32>
    %598 = math.tanh %597 : vector<1x16xf32>
    %599 = arith.mulf %594, %598 : vector<1x16xf32>
    %c0_155 = arith.constant 0 : index
    %c6_156 = arith.constant 6 : index
    %c0_157 = arith.constant 0 : index
    %600 = vector.load %arg1[%c0_155, %c6_156, %c0_157] : memref<1x8x1xf32, #tpu.memory_space<vmem>>, vector<1x1x1xf32>
    %601 = vector.shape_cast %600 : vector<1x1x1xf32> to vector<1x1xf32>
    %cst_158 = arith.constant 0.000000e+00 : f32
    %602 = vector.broadcast %cst_158 : f32 to vector<1x1xf32>
    %603 = arith.cmpf ogt, %601, %602 : vector<1x1xf32>
    %c0_159 = arith.constant 0 : index
    %c1_160 = arith.constant 1 : index
    %c0_161 = arith.constant 0 : index
    %604 = vector.load %arg1[%c0_159, %c1_160, %c0_161] : memref<1x8x1xf32, #tpu.memory_space<vmem>>, vector<1x1x1xf32>
    %605 = vector.shape_cast %604 : vector<1x1x1xf32> to vector<1x1xf32>
    %cst_162 = arith.constant 0.000000e+00 : f32
    %606 = vector.broadcast %cst_162 : f32 to vector<1x1xf32>
    %607 = arith.cmpf ogt, %605, %606 : vector<1x1xf32>
    %cst_163 = arith.constant 0.000000e+00 : f32
    %608 = vector.shape_cast %603 : vector<1x1xi1> to vector<1x1xi1>
    %609 = vector.broadcast %608 : vector<1x1xi1> to vector<1x16xi1>
    %610 = vector.broadcast %cst_163 : f32 to vector<1x16xf32>
    %611 = arith.select %609, %574, %610 : vector<1x16xi1>, vector<1x16xf32>
    %cst_164 = arith.constant 0.000000e+00 : f32
    %612 = vector.shape_cast %607 : vector<1x1xi1> to vector<1x1xi1>
    %613 = vector.broadcast %612 : vector<1x1xi1> to vector<1x16xi1>
    %614 = vector.broadcast %cst_164 : f32 to vector<1x16xf32>
    %615 = arith.select %613, %599, %614 : vector<1x16xi1>, vector<1x16xf32>
    %616 = vector.shape_cast %603 : vector<1x1xi1> to vector<1x1xi1>
    %617 = vector.broadcast %616 : vector<1x1xi1> to vector<1x16xi1>
    %618 = arith.select %617, %574, %530 : vector<1x16xi1>, vector<1x16xf32>
    %619 = vector.shape_cast %603 : vector<1x1xi1> to vector<1x1xi1>
    %620 = vector.broadcast %619 : vector<1x1xi1> to vector<1x16xi1>
    %621 = arith.select %620, %572, %533 : vector<1x16xi1>, vector<1x16xf32>
    %622 = vector.shape_cast %607 : vector<1x1xi1> to vector<1x1xi1>
    %623 = vector.broadcast %622 : vector<1x1xi1> to vector<1x16xi1>
    %624 = arith.select %623, %599, %536 : vector<1x16xi1>, vector<1x16xf32>
    %625 = vector.shape_cast %607 : vector<1x1xi1> to vector<1x1xi1>
    %626 = vector.broadcast %625 : vector<1x1xi1> to vector<1x16xi1>
    %627 = arith.select %626, %597, %539 : vector<1x16xi1>, vector<1x16xf32>
    %628 = tpu.concatenate %618, %624 in 1 : vector<1x16xf32>, vector<1x16xf32> -> vector<1x32xf32>
    %cst_165 = arith.constant dense<0.000000e+00> : vector<1x128xf32>
    %629 = tpu.matmul %628, %2, %cst_165 {dimension_numbers = #tpu.dot_dimension_numbers<[1], [0], [0], [1], [0, 0, 1, 1], [], []>} : vector<1x32xf32>, vector<32x128xf32>, vector<1x128xf32> -> vector<1x128xf32>
    %c0_166 = arith.constant 0 : index
    %c7_167 = arith.constant 7 : index
    %c0_168 = arith.constant 0 : index
    %630 = vector.load %arg8[%c0_166, %c7_167, %c0_168] : memref<1x8x128xf32, #tpu.memory_space<vmem>>, vector<1x1x64xf32>
    %631 = vector.shape_cast %630 : vector<1x1x64xf32> to vector<1x64xf32>
    %632 = vector.extract_strided_slice %629 {offsets = [0, 0], sizes = [1, 64], strides = [1, 1]} : vector<1x128xf32> to vector<1x64xf32>
    %633 = arith.addf %631, %632 : vector<1x64xf32>
    %c0_169 = arith.constant 0 : index
    %c0_170 = arith.constant 0 : index
    %c64_171 = arith.constant 64 : index
    %634 = vector.load %arg8[%c0_169, %c0_170, %c64_171] : memref<1x8x128xf32, #tpu.memory_space<vmem>>, vector<1x1x64xf32>
    %635 = vector.shape_cast %634 : vector<1x1x64xf32> to vector<1x64xf32>
    %636 = vector.extract_strided_slice %629 {offsets = [0, 64], sizes = [1, 64], strides = [1, 1]} : vector<1x128xf32> to vector<1x64xf32>
    %637 = arith.addf %635, %636 : vector<1x64xf32>
    %638 = vector.extract_strided_slice %633 {offsets = [0, 0], sizes = [1, 16], strides = [1, 1]} : vector<1x64xf32> to vector<1x16xf32>
    %639 = arith.negf %638 : vector<1x16xf32>
    %640 = math.exp %639 : vector<1x16xf32>
    %cst_172 = arith.constant 1.000000e+00 : f32
    %641 = vector.broadcast %cst_172 : f32 to vector<1x16xf32>
    %642 = arith.addf %641, %640 : vector<1x16xf32>
    %643 = arith.divf %641, %642 : vector<1x16xf32>
    %644 = vector.extract_strided_slice %633 {offsets = [0, 16], sizes = [1, 16], strides = [1, 1]} : vector<1x64xf32> to vector<1x16xf32>
    %645 = arith.negf %644 : vector<1x16xf32>
    %646 = math.exp %645 : vector<1x16xf32>
    %cst_173 = arith.constant 1.000000e+00 : f32
    %647 = vector.broadcast %cst_173 : f32 to vector<1x16xf32>
    %648 = arith.addf %647, %646 : vector<1x16xf32>
    %649 = arith.divf %647, %648 : vector<1x16xf32>
    %650 = vector.extract_strided_slice %633 {offsets = [0, 32], sizes = [1, 16], strides = [1, 1]} : vector<1x64xf32> to vector<1x16xf32>
    %651 = math.tanh %650 : vector<1x16xf32>
    %652 = vector.extract_strided_slice %633 {offsets = [0, 48], sizes = [1, 16], strides = [1, 1]} : vector<1x64xf32> to vector<1x16xf32>
    %653 = arith.negf %652 : vector<1x16xf32>
    %654 = math.exp %653 : vector<1x16xf32>
    %cst_174 = arith.constant 1.000000e+00 : f32
    %655 = vector.broadcast %cst_174 : f32 to vector<1x16xf32>
    %656 = arith.addf %655, %654 : vector<1x16xf32>
    %657 = arith.divf %655, %656 : vector<1x16xf32>
    %658 = arith.mulf %649, %621 : vector<1x16xf32>
    %659 = arith.mulf %643, %651 : vector<1x16xf32>
    %660 = arith.addf %658, %659 : vector<1x16xf32>
    %661 = math.tanh %660 : vector<1x16xf32>
    %662 = arith.mulf %657, %661 : vector<1x16xf32>
    %663 = vector.extract_strided_slice %637 {offsets = [0, 0], sizes = [1, 16], strides = [1, 1]} : vector<1x64xf32> to vector<1x16xf32>
    %664 = arith.negf %663 : vector<1x16xf32>
    %665 = math.exp %664 : vector<1x16xf32>
    %cst_175 = arith.constant 1.000000e+00 : f32
    %666 = vector.broadcast %cst_175 : f32 to vector<1x16xf32>
    %667 = arith.addf %666, %665 : vector<1x16xf32>
    %668 = arith.divf %666, %667 : vector<1x16xf32>
    %669 = vector.extract_strided_slice %637 {offsets = [0, 16], sizes = [1, 16], strides = [1, 1]} : vector<1x64xf32> to vector<1x16xf32>
    %670 = arith.negf %669 : vector<1x16xf32>
    %671 = math.exp %670 : vector<1x16xf32>
    %cst_176 = arith.constant 1.000000e+00 : f32
    %672 = vector.broadcast %cst_176 : f32 to vector<1x16xf32>
    %673 = arith.addf %672, %671 : vector<1x16xf32>
    %674 = arith.divf %672, %673 : vector<1x16xf32>
    %675 = vector.extract_strided_slice %637 {offsets = [0, 32], sizes = [1, 16], strides = [1, 1]} : vector<1x64xf32> to vector<1x16xf32>
    %676 = math.tanh %675 : vector<1x16xf32>
    %677 = vector.extract_strided_slice %637 {offsets = [0, 48], sizes = [1, 16], strides = [1, 1]} : vector<1x64xf32> to vector<1x16xf32>
    %678 = arith.negf %677 : vector<1x16xf32>
    %679 = math.exp %678 : vector<1x16xf32>
    %cst_177 = arith.constant 1.000000e+00 : f32
    %680 = vector.broadcast %cst_177 : f32 to vector<1x16xf32>
    %681 = arith.addf %680, %679 : vector<1x16xf32>
    %682 = arith.divf %680, %681 : vector<1x16xf32>
    %683 = arith.mulf %674, %627 : vector<1x16xf32>
    %684 = arith.mulf %668, %676 : vector<1x16xf32>
    %685 = arith.addf %683, %684 : vector<1x16xf32>
    %686 = math.tanh %685 : vector<1x16xf32>
    %687 = arith.mulf %682, %686 : vector<1x16xf32>
    %c0_178 = arith.constant 0 : index
    %c7_179 = arith.constant 7 : index
    %c0_180 = arith.constant 0 : index
    %688 = vector.load %arg1[%c0_178, %c7_179, %c0_180] : memref<1x8x1xf32, #tpu.memory_space<vmem>>, vector<1x1x1xf32>
    %689 = vector.shape_cast %688 : vector<1x1x1xf32> to vector<1x1xf32>
    %cst_181 = arith.constant 0.000000e+00 : f32
    %690 = vector.broadcast %cst_181 : f32 to vector<1x1xf32>
    %691 = arith.cmpf ogt, %689, %690 : vector<1x1xf32>
    %c0_182 = arith.constant 0 : index
    %c0_183 = arith.constant 0 : index
    %c0_184 = arith.constant 0 : index
    %692 = vector.load %arg1[%c0_182, %c0_183, %c0_184] : memref<1x8x1xf32, #tpu.memory_space<vmem>>, vector<1x1x1xf32>
    %693 = vector.shape_cast %692 : vector<1x1x1xf32> to vector<1x1xf32>
    %cst_185 = arith.constant 0.000000e+00 : f32
    %694 = vector.broadcast %cst_185 : f32 to vector<1x1xf32>
    %695 = arith.cmpf ogt, %693, %694 : vector<1x1xf32>
    %cst_186 = arith.constant 0.000000e+00 : f32
    %696 = vector.shape_cast %691 : vector<1x1xi1> to vector<1x1xi1>
    %697 = vector.broadcast %696 : vector<1x1xi1> to vector<1x16xi1>
    %698 = vector.broadcast %cst_186 : f32 to vector<1x16xf32>
    %699 = arith.select %697, %662, %698 : vector<1x16xi1>, vector<1x16xf32>
    %cst_187 = arith.constant 0.000000e+00 : f32
    %700 = vector.shape_cast %695 : vector<1x1xi1> to vector<1x1xi1>
    %701 = vector.broadcast %700 : vector<1x1xi1> to vector<1x16xi1>
    %702 = vector.broadcast %cst_187 : f32 to vector<1x16xf32>
    %703 = arith.select %701, %687, %702 : vector<1x16xi1>, vector<1x16xf32>
    %704 = vector.shape_cast %691 : vector<1x1xi1> to vector<1x1xi1>
    %705 = vector.broadcast %704 : vector<1x1xi1> to vector<1x16xi1>
    %706 = arith.select %705, %662, %618 : vector<1x16xi1>, vector<1x16xf32>
    %707 = vector.shape_cast %695 : vector<1x1xi1> to vector<1x1xi1>
    %708 = vector.broadcast %707 : vector<1x1xi1> to vector<1x16xi1>
    %709 = arith.select %708, %687, %624 : vector<1x16xi1>, vector<1x16xf32>
    %710 = tpu.concatenate %83, %703 in 1 : vector<1x16xf32>, vector<1x16xf32> -> vector<1x32xf32>
    %c0_188 = arith.constant 0 : index
    %c0_189 = arith.constant 0 : index
    %c0_190 = arith.constant 0 : index
    %711 = vector.load %arg6[%c0_188, %c0_189, %c0_190] : memref<1x8x32xf32, #tpu.memory_space<vmem>>, vector<1x1x32xf32>
    %712 = vector.shape_cast %711 : vector<1x1x32xf32> to vector<1x32xf32>
    %713 = vector.shape_cast %710 : vector<1x32xf32> to vector<1x1x32xf32>
    tpu.vector_store %arg6[%c0_188, %c0_189, %c0_190], %713 {strides = array<i32>} : memref<1x8x32xf32, #tpu.memory_space<vmem>>, vector<1x1x32xf32>,
    %714 = tpu.concatenate %171, %615 in 1 : vector<1x16xf32>, vector<1x16xf32> -> vector<1x32xf32>
    %c0_191 = arith.constant 0 : index
    %c1_192 = arith.constant 1 : index
    %c0_193 = arith.constant 0 : index
    %715 = vector.load %arg6[%c0_191, %c1_192, %c0_193] : memref<1x8x32xf32, #tpu.memory_space<vmem>>, vector<1x1x32xf32>
    %716 = vector.shape_cast %715 : vector<1x1x32xf32> to vector<1x32xf32>
    %717 = vector.shape_cast %714 : vector<1x32xf32> to vector<1x1x32xf32>
    tpu.vector_store %arg6[%c0_191, %c1_192, %c0_193], %717 {strides = array<i32>} : memref<1x8x32xf32, #tpu.memory_space<vmem>>, vector<1x1x32xf32>,
    %718 = tpu.concatenate %259, %527 in 1 : vector<1x16xf32>, vector<1x16xf32> -> vector<1x32xf32>
    %c0_194 = arith.constant 0 : index
    %c2_195 = arith.constant 2 : index
    %c0_196 = arith.constant 0 : index
    %719 = vector.load %arg6[%c0_194, %c2_195, %c0_196] : memref<1x8x32xf32, #tpu.memory_space<vmem>>, vector<1x1x32xf32>
    %720 = vector.shape_cast %719 : vector<1x1x32xf32> to vector<1x32xf32>
    %721 = vector.shape_cast %718 : vector<1x32xf32> to vector<1x1x32xf32>
    tpu.vector_store %arg6[%c0_194, %c2_195, %c0_196], %721 {strides = array<i32>} : memref<1x8x32xf32, #tpu.memory_space<vmem>>, vector<1x1x32xf32>,
    %722 = tpu.concatenate %347, %439 in 1 : vector<1x16xf32>, vector<1x16xf32> -> vector<1x32xf32>
    %c0_197 = arith.constant 0 : index
    %c3_198 = arith.constant 3 : index
    %c0_199 = arith.constant 0 : index
    %723 = vector.load %arg6[%c0_197, %c3_198, %c0_199] : memref<1x8x32xf32, #tpu.memory_space<vmem>>, vector<1x1x32xf32>
    %724 = vector.shape_cast %723 : vector<1x1x32xf32> to vector<1x32xf32>
    %725 = vector.shape_cast %722 : vector<1x32xf32> to vector<1x1x32xf32>
    tpu.vector_store %arg6[%c0_197, %c3_198, %c0_199], %725 {strides = array<i32>} : memref<1x8x32xf32, #tpu.memory_space<vmem>>, vector<1x1x32xf32>,
    %726 = tpu.concatenate %435, %351 in 1 : vector<1x16xf32>, vector<1x16xf32> -> vector<1x32xf32>
    %c0_200 = arith.constant 0 : index
    %c4_201 = arith.constant 4 : index
    %c0_202 = arith.constant 0 : index
    %727 = vector.load %arg6[%c0_200, %c4_201, %c0_202] : memref<1x8x32xf32, #tpu.memory_space<vmem>>, vector<1x1x32xf32>
    %728 = vector.shape_cast %727 : vector<1x1x32xf32> to vector<1x32xf32>
    %729 = vector.shape_cast %726 : vector<1x32xf32> to vector<1x1x32xf32>
    tpu.vector_store %arg6[%c0_200, %c4_201, %c0_202], %729 {strides = array<i32>} : memref<1x8x32xf32, #tpu.memory_space<vmem>>, vector<1x1x32xf32>,
    %730 = tpu.concatenate %523, %263 in 1 : vector<1x16xf32>, vector<1x16xf32> -> vector<1x32xf32>
    %c0_203 = arith.constant 0 : index
    %c5_204 = arith.constant 5 : index
    %c0_205 = arith.constant 0 : index
    %731 = vector.load %arg6[%c0_203, %c5_204, %c0_205] : memref<1x8x32xf32, #tpu.memory_space<vmem>>, vector<1x1x32xf32>
    %732 = vector.shape_cast %731 : vector<1x1x32xf32> to vector<1x32xf32>
    %733 = vector.shape_cast %730 : vector<1x32xf32> to vector<1x1x32xf32>
    tpu.vector_store %arg6[%c0_203, %c5_204, %c0_205], %733 {strides = array<i32>} : memref<1x8x32xf32, #tpu.memory_space<vmem>>, vector<1x1x32xf32>,
    %734 = tpu.concatenate %611, %175 in 1 : vector<1x16xf32>, vector<1x16xf32> -> vector<1x32xf32>
    %c0_206 = arith.constant 0 : index
    %c6_207 = arith.constant 6 : index
    %c0_208 = arith.constant 0 : index
    %735 = vector.load %arg6[%c0_206, %c6_207, %c0_208] : memref<1x8x32xf32, #tpu.memory_space<vmem>>, vector<1x1x32xf32>
    %736 = vector.shape_cast %735 : vector<1x1x32xf32> to vector<1x32xf32>
    %737 = vector.shape_cast %734 : vector<1x32xf32> to vector<1x1x32xf32>
    tpu.vector_store %arg6[%c0_206, %c6_207, %c0_208], %737 {strides = array<i32>} : memref<1x8x32xf32, #tpu.memory_space<vmem>>, vector<1x1x32xf32>,
    %738 = tpu.concatenate %699, %87 in 1 : vector<1x16xf32>, vector<1x16xf32> -> vector<1x32xf32>
    %c0_209 = arith.constant 0 : index
    %c7_210 = arith.constant 7 : index
    %c0_211 = arith.constant 0 : index
    %739 = vector.load %arg6[%c0_209, %c7_210, %c0_211] : memref<1x8x32xf32, #tpu.memory_space<vmem>>, vector<1x1x32xf32>
    %740 = vector.shape_cast %739 : vector<1x1x32xf32> to vector<1x32xf32>
    %741 = vector.shape_cast %738 : vector<1x32xf32> to vector<1x1x32xf32>
    tpu.vector_store %arg6[%c0_209, %c7_210, %c0_211], %741 {strides = array<i32>} : memref<1x8x32xf32, #tpu.memory_space<vmem>>, vector<1x1x32xf32>,
    %742 = tpu.concatenate %706, %709 in 1 : vector<1x16xf32>, vector<1x16xf32> -> vector<1x32xf32>
    %c0_212 = arith.constant 0 : index
    %c0_213 = arith.constant 0 : index
    %c0_214 = arith.constant 0 : index
    %743 = vector.load %arg7[%c0_212, %c0_213, %c0_214] : memref<1x1x32xf32, #tpu.memory_space<vmem>>, vector<1x1x32xf32>
    %744 = vector.shape_cast %743 : vector<1x1x32xf32> to vector<1x32xf32>
    %745 = vector.shape_cast %742 : vector<1x32xf32> to vector<1x1x32xf32>
    tpu.vector_store %arg7[%c0_212, %c0_213, %c0_214], %745 {strides = array<i32>} : memref<1x1x32xf32, #tpu.memory_space<vmem>>, vector<1x1x32xf32>,
    return
  }
  func.func @transform_0(%arg0: i32) -> (i32, i32, i32) {
    %c0_i32 = arith.constant 0 : i32
    %c0_i32_0 = arith.constant 0 : i32
    %c0_i32_1 = arith.constant 0 : i32
    return %arg0, %c0_i32, %c0_i32_0 : i32, i32, i32
  }
  func.func @transform_1(%arg0: i32) -> (i32, i32, i32) {
    %c0_i32 = arith.constant 0 : i32
    %c0_i32_0 = arith.constant 0 : i32
    %c0_i32_1 = arith.constant 0 : i32
    return %arg0, %c0_i32, %c0_i32_0 : i32, i32, i32
  }
  func.func @transform_2(%arg0: i32) -> (i32, i32) {
    %c0_i32 = arith.constant 0 : i32
    %c0_i32_0 = arith.constant 0 : i32
    %c0_i32_1 = arith.constant 0 : i32
    return %c0_i32, %c0_i32_0 : i32, i32
  }
  func.func @transform_3(%arg0: i32) -> (i32, i32) {
    %c0_i32 = arith.constant 0 : i32
    %c0_i32_0 = arith.constant 0 : i32
    %c0_i32_1 = arith.constant 0 : i32
    return %c0_i32, %c0_i32_0 : i32, i32
  }
  func.func @transform_4(%arg0: i32) -> (i32, i32) {
    %c0_i32 = arith.constant 0 : i32
    %c0_i32_0 = arith.constant 0 : i32
    %c0_i32_1 = arith.constant 0 : i32
    return %c0_i32, %c0_i32_0 : i32, i32
  }
  func.func @transform_5(%arg0: i32) -> (i32, i32, i32) {
    %c0_i32 = arith.constant 0 : i32
    %c0_i32_0 = arith.constant 0 : i32
    %c0_i32_1 = arith.constant 0 : i32
    return %arg0, %c0_i32, %c0_i32_0 : i32, i32, i32
  }
  func.func @transform_6(%arg0: i32) -> (i32, i32, i32) {
    %c0_i32 = arith.constant 0 : i32
    %c0_i32_0 = arith.constant 0 : i32
    %c0_i32_1 = arith.constant 0 : i32
    return %arg0, %c0_i32, %c0_i32_0 : i32, i32, i32
  }
}

</mosaic_0001>

<bundles_post_ra>
// kernel: tpu_custom_call.1
= control target key start
LH: loop header
LB: loop body
LE: loop exit
PB: predicated region body
PF: predicated region fallthrough
CT: control target
= control target key end

     0   :  { %12 = vsyncpa [#allocation4], 0  ;;  %s2650_s0 = inlined_call_operand.vmem [shape: f32[2,8,1], index: 0, kind: input, shape index: {}]   ;;  %s2651_s1 = inlined_call_operand.vmem [shape: f32[2,8,16], index: 1, kind: input, shape index: {}]   ;;  %s2652_s2 = inlined_call_operand.hbm [shape: f32[16,128], index: 2, kind: input, shape index: {}]   ;;  %s2653_s3 = inlined_call_operand.vmem [shape: f32[1,128], index: 3, kind: input, shape index: {}]   ;;  %s2654_s4 = inlined_call_operand.hbm [shape: f32[32,128], index: 4, kind: input, shape index: {}]   ;;  %s2655_s5 = inlined_call_operand.hbm [shape: f32[2,8,32], index: 5, kind: output, shape index: {0}]   ;;  %s2656_s6 = inlined_call_operand.hbm [shape: f32[2,1,32], index: 6, kind: output, shape index: {1}]  }
   0x1   :  { %13 = vsyncpa [#allocation7], 0 }
   0x2   :  { %14 = vsyncpa [#allocation5], 0 }
   0x3   :  { %16 = vsyncpa [#allocation5 + $0x1], 0 }
   0x4   :  { %17 = vsyncpa [#allocation10], 0 }
   0x5   :  { %19 = vsyncpa [#allocation10 + $0x1], 0  ;;  %s2000_s21 = smov 0   ;;  %s2002_s22 = smov 0  }
   0x6   :  { %s2004_s23 = smov 0   ;;  %s2006_s24 = smov 0  }
   0x7 LB: > { %s2021_s25 = sadd.s32 4294967295, %s1953_s24   ;;  %s1545_s26 = sadd.s32 4294967294, %s1953_s24   ;;  %s1953_s24 = sphi %s2006_s24, %s2669_s24   ;;  %s1949_s23 = sphi %s2004_s23, %s2668_s23   ;;  %s1945_s22 = sphi %s2002_s22, %s2667_s22   ;;  %s1941_s21 = sphi %s2000_s21, %s2666_s21  }
   0x8   : > { %s2025_s27 = sadd.s32 1, %s1953_s24   ;;  %s147_s28 = sadd.s32 1, %s1949_s23 }
   0x9   : > { %s144_s29 = ssub.s32 %s1953_s24, %s2025_s27  ;;  %p157_p0 = scmp.ne.s32.totalorder %s1949_s23, %s1945_s22 }
   0xa   : > { %p145_p1 = scmp.eq.s32.totalorder %s144_s29, 0  ;;  %p158_p2 = scmp.eq.s32.totalorder %s2021_s25, 1 }
   0xb   : > { %p163_p3 = scmp.ne.s32.totalorder %s1945_s22, %s1941_s21  ;;  %p164_p4 = scmp.eq.s32.totalorder %s1545_s26, 1 }
   0xc   : > { %s2036_s30 = scalar_select %p145_p1, %s1949_s23, %s147_s28  }
   0xd   : > { %p2038_p5 = por %p158_p2, %p157_p0  ;;  %p2042_p6 = por %p164_p4, %p163_p3 }
   0xe   : > { %p1546_p7 = scmp.ge.s32.totalorder %s1953_s24, 1  ;;  %p197_p8 = scmp.lt.s32.totalorder %s1953_s24, 3 }
   0xf   : > { %p1610_p9 = scmp.eq.s32.totalorder %s2021_s25, 0  ;;  %s208_s12 = sshll.u32 %s2652_s2, 4  ;;  %s209_s12 = int_to_ptr.hbm [resolvable:$true] %s208_s12 }
  0x10   : > { %p2049_p10 = pnand %p1546_p7, %p197_p8  ;;  %s1955_s13 = smov [#allocation3]  }
  0x11   : > { %s210_s14 = sshll.u32 %s1955_s13, 4  ;;  %s225_s17 = sshll.u32 %s2654_s4, 4  ;;  %s211_s14 = int_to_ptr.vmem [resolvable:$true] %s210_s14  ;;  %s226_s17 = int_to_ptr.hbm [resolvable:$true] %s225_s17 }
  0x12   : > { %p1596_p11 = pneg %p2049_p10  ;;  %s1956_s18 = smov 128  }
  0x13   : > { %s1957_s19 = smov 8   ;;  %s1958_s20 = smov [#allocation6]  }
  0x14   : > { %p1597_p12 = pnand %p1610_p9, %p1596_p11  ;;  %s227_s26 = sshll.u32 %s1958_s20, 4  ;;  %s228_s26 = int_to_ptr.vmem [resolvable:$true] %s227_s26 }
  0x15   : > { %257 = sbr.rel (%p2049_p10) target bundleno = 4797 (0x12bd), region = 40 }
  0x16   : > { %1599 = dma.hbm_to_vmem [thread:$0]  (!%p1597_p12), %s209_s12, 256, %s211_s14, [#allocation4], %s1956_s18, %s1956_s18, %s1957_s19  }
  0x17   : > { %1602 = dma.hbm_to_vmem [thread:$0]  (!%p1597_p12), %s226_s17, 512, %s228_s26, [#allocation7], %s1956_s18, %s1956_s18, %s1957_s19  }
  0x1a   : > { %1924 = dma.done.wait (%p1610_p9), [#allocation4], 256  }
  0x1b   : > { %1926 = vsyncadd (%p1610_p9), [#allocation4], 4294967040 }
  0x1c   : > { %1928 = dma.done.wait (%p1610_p9), [#allocation7], 512  }
  0x1d   : > { %1930 = vsyncadd (%p1610_p9), [#allocation7], 4294966784  ;;  %p300_p13 = scmp.lt.s32.totalorder %s2021_s25, 1  ;;  %v309_v0 = vld [vmem:[#allocation3 + $0x8] sm:$0xff]  ;;  %v308_v1 = vld [vmem:[#allocation3] sm:$0xff]  ;;  %vm319_vm0 = vcmask 130048   ;;  %s1419_s15 = scalar_lea.hbm %s2656_s6, %s2021_s25 }
  0x1e   : > { %337 = vmatpush.msra.mxu0 %v309_v0  ;;  %v314_v3 = vld [vmem:[#allocation6 + $0x18] sm:$0xff]  ;;  %v313_v4 = vld [vmem:[#allocation6 + $0x10] sm:$0xff]  ;;  %v312_v5 = vld [vmem:[#allocation6 + $0x8] sm:$0xff]  ;;  %v1959_v7 = vmov 0.0   ;;  %s1960_s14 = smov 96   ;;  %v1961_v22 = vmov 0  }
  0x1f   : > { %s2075_s28 = scalar_select %p300_p13, %s2021_s25, 1  ;;  %360 = vmatpush.msra.mxu1 %v314_v3  ;;  %488 = vmatpush.msra.mxu2 %v314_v3  ;;  %v311_v6 = vld [vmem:[#allocation6] sm:$0xff]  ;;  %v1660_v8 = vld [vmem:[%s2653_s3] ss:$0 sm:$0xff]  ;;  %vm344_vm13 = vcmask 261120  }
  0x20   : > { %338 = vmatpush.msra.mxu0 %v308_v1  ;;  %618 = vmatpush.msra.mxu3 %v314_v3  ;;  %s1962_s18 = smov 16   ;;  %s1963_s19 = smov 32  }
  0x21   : > { %s1554_s29 = sshll.u32 %s2075_s28, 3  ;;  %361 = vmatpush.msra.mxu1 %v313_v4  ;;  %489 = vmatpush.msra.mxu2 %v313_v4  ;;  %s1964_s20 = smov 80  }
  0x22   : > { %s307_s11 = scalar_lea.vmem %s2651_s1, %s1554_s29  ;;  %619 = vmatpush.msra.mxu3 %v313_v4  ;;  %748 = vmatpush.msrb.mxu0 %v314_v3  ;;  %s2094_s17 = scalar_lea.vmem %s2650_s0, %s1554_s29 }
  0x23   : > { %v315_v2 = vld [vmem:[%s307_s11] sm:$0xff]  ;;  %362 = vmatpush.msra.mxu1 %v312_v5  ;;  %490 = vmatpush.msra.mxu2 %v312_v5  ;;  %s2542_s26 = sand.u32 1, %s1945_s22   ;;  %s1581_s9 = sshll.u32 %s2021_s25, 3 }
  0x24   : > { %1556 = vmatmul.msk.f32.vlgmr.msra.gmra.mxu0 %vm319_vm0, %v315_v2  ;;  %620 = vmatpush.msra.mxu3 %v312_v5  ;;  %v446_v23 = vld [vmem:[%s2094_s17] sm:$0x1]  ;;  %v448_v51 = vld [vmem:[%s2094_s17 + $0x7] sm:$0x1]  ;;  %s1553_s28 = sshll.u32 %s2542_s26, 3  ;;  %s1406_s12 = scalar_lea.hbm %s2655_s5, %s1581_s9 }
  0x25   : > { %363 = vmatpush.msra.mxu1 %v311_v6  ;;  %749 = vmatpush.msrb.mxu0 %v313_v4  ;;  %vm447_vm1 = vcmp.gt.f32.partialorder %v446_v23, 0.0  ;;  %vm449_vm10 = vcmp.gt.f32.partialorder %v448_v51, 0.0  ;;  %s2556_s29 = scalar_lea.vmem [#allocation8], %s1553_s28  ;;  %s1392_s25 = scalar_lea.sflag [#allocation5], %s2542_s26 }
  0x26   : > { %364 = vmatmul.f32.vlgmr.msra.gmra.mxu1 %v1959_v7  ;;  %491 = vmatpush.msra.mxu2 %v311_v6  ;;  %v450_v24 = vsel %vm447_vm1, 1, %v1961_v22  ;;  %v456_v52 = vsel %vm449_vm10, 1, %v1961_v22  ;;  %s1408_s16 = sshll.u32 %s2556_s29, 4  ;;  %s1409_s16 = int_to_ptr.vmem [resolvable:$true] %s1408_s16 }
  0x27   : > { %621 = vmatpush.msra.mxu3 %v311_v6  ;;  %750 = vmatpush.msrb.mxu0 %v312_v5 }
  0x28   : > { %878 = vmatpush.msrb.mxu1 %v314_v3  ;;  %992 = vmatpush.msrb.mxu2 %v314_v3 }
  0x29   : > { %751 = vmatpush.msrb.mxu0 %v311_v6  ;;  %1106 = vmatpush.msrb.mxu3 %v314_v3 }
  0x2a   : > { %879 = vmatpush.msrb.mxu1 %v313_v4  ;;  %993 = vmatpush.msrb.mxu2 %v313_v4 }
  0x2b   : > { %1107 = vmatpush.msrb.mxu3 %v313_v4  ;;  %1220 = vmatpush.msra.mxu0 %v314_v3 }
  0x2c   : > { %880 = vmatpush.msrb.mxu1 %v312_v5  ;;  %994 = vmatpush.msrb.mxu2 %v312_v5 }
  0x2d   : > { %1108 = vmatpush.msrb.mxu3 %v312_v5  ;;  %1221 = vmatpush.msra.mxu0 %v313_v4 }
  0x2e   : > { %881 = vmatpush.msrb.mxu1 %v311_v6  ;;  %995 = vmatpush.msrb.mxu2 %v311_v6 }
  0x2f   : > { %1109 = vmatpush.msrb.mxu3 %v311_v6  ;;  %1222 = vmatpush.msra.mxu0 %v312_v5 }
  0x30   : > { %1657 = vset.pattern.permute.xlu0 %v1961_v22  ;;  %1658 = vset.pattern.permute.xlu1 %v1961_v22 }
  0x31   : > { %1223 = vmatpush.msra.mxu0 %v311_v6  ;;  %1659 = vset.pattern.permute.xlu2 %v1961_v22 }
  0xa1   : > { %v340_v9 = vpop.f32.mrf.mxu0 }
  0xa2   : > { %v341_v10 = vadd.f32 %v1660_v8, %v340_v9 }
  0xa3   : > { %v365_v11 = vpop.f32.mrf.mxu1 }
  0xa4   : > { %343 = vst [vmem:[#allocation2] sm:$0xff] %v341_v10 }
  0xab   : > { %v368_v12 = vld [vmem:[#allocation2] sm:$0x1]  ;;  %v370_v14 = vld [vmem:[#allocation2 + $0x7] sm:$0x1]  ;;  %v2139_v9 = vld [vmem:[#allocation2 + $0x1] sm:$0x1] }
  0xac   : > { %v369_v13 = vadd.f32 %v368_v12, %v365_v11  ;;  %v371_v15 = vadd.f32 %v370_v14, %v365_v11  ;;  %v2141_v10 = vld [vmem:[#allocation2 + $0x6] sm:$0x1] }
  0xae   : > { %1661 = vtanh.f32 %v369_v13  ;;  %v1557_v18 = vmul.f32 -1.442695, %v369_v13  ;;  %v1558_v19 = vmul.f32 -1.442695, %v371_v15 }
  0xaf   : > { %1663 = vtanh.f32 %v371_v15 }
  0xb0   : > { %1665 = vpow2.f32 %v1557_v18 }
  0xb1   : > { %1667 = vpow2.f32 %v1558_v19 }
  0xb4   : > { %v1662_v16 = vpop.eup %1661 }
  0xb5   : > { %394 = vrot.lane.b32.xlu0 %v1662_v16, %s1960_s14  ;;  %v1664_v17 = vpop.eup %1663 }
  0xb6   : > { %v1666_v20 = vpop.eup %1665 }
  0xb7   : > { %v375_v21 = vadd.f32 1.0, %v1666_v20  ;;  %v1668_v25 = vpop.eup %1667 }
  0xb8   : > { %v412_v26 = vadd.f32 1.0, %v1668_v25 }
  0xb9   : > { %1669 = vrcp.f32 %v375_v21  ;;  %v387_v35 = vand.u32 2147483648, %v375_v21  ;;  %vm381_vm3 = vweird.f32 %v375_v21  ;;  %v385_v36 = vand.u32 2147483647, %v375_v21 }
  0xba   : > { %1671 = vrcp.f32 %v412_v26  ;;  %v424_v44 = vand.u32 2147483648, %v412_v26  ;;  %vm418_vm7 = vweird.f32 %v412_v26  ;;  %v422_v45 = vand.u32 2147483647, %v412_v26 }
  0xbb   : > { %v388_v39 = vor.u32 1.1754944e-38, %v387_v35  ;;  %vm386_vm5 = vcmp.eq.f32.partialorder %v385_v36, 8.507059e+37 }
  0xbc   : > { %v425_v47 = vor.u32 1.1754944e-38, %v424_v44  ;;  %vm423_vm9 = vcmp.eq.f32.partialorder %v422_v45, 8.507059e+37 }
  0xbd   : > { %431 = vrot.lane.b32.xlu0 %v1664_v17, %s1960_s14 }
  0xbf   : > { %v1670_v27 = vpop.eup %1669 }
  0xc0   : > { %v377_v28 = vmul.f32 %v1670_v27, %v375_v21  ;;  %v1672_v30 = vpop.eup %1671  ;;  %vm382_vm2 = vweird.f32 %v1670_v27 }
  0xc1   : > { %v414_v32 = vmul.f32 %v1672_v30, %v412_v26  ;;  %vm383_vm4 = vmor %vm381_vm3, %vm382_vm2  ;;  %vm419_vm6 = vweird.f32 %v1672_v30 }
  0xc2   : > { %v378_v29 = vsub.f32 1.0, %v377_v28  ;;  %vm420_vm8 = vmor %vm418_vm7, %vm419_vm6 }
  0xc3   : > { %v415_v34 = vsub.f32 1.0, %v414_v32 }
  0xc4   : > { %v379_v31 = vmul.f32 %v1670_v27, %v378_v29 }
  0xc5   : > { %452 = vperm.xlu0 %1657, %v450_v24   ;;  %v416_v38 = vmul.f32 %v1672_v30, %v415_v34 }
  0xc6   : > { %v380_v33 = vadd.f32 %v1670_v27, %v379_v31 }
  0xc7   : > { %v417_v43 = vadd.f32 %v1672_v30, %v416_v38 }
  0xc8   : > { %v384_v37 = vsel %vm383_vm4, %v1670_v27, %v380_v33 }
  0xc9   : > { %v389_v41 = vsel %vm386_vm5, %v388_v39, %v384_v37  ;;  %v421_v46 = vsel %vm420_vm8, %v1672_v30, %v417_v43 }
  0xca   : > { %v426_v48 = vsel %vm423_vm9, %v425_v47, %v421_v46  ;;  %v392_v53 = vmul.f32 0.0, %v389_v41  ;;  %v574_v46 = vld [vmem:[%s2094_s17 + $0x1] sm:$0x1] }
  0xcb   : > { %v429_v56 = vmul.f32 0.0, %v426_v48  ;;  %vm575_vm7 = vcmp.gt.f32.partialorder %v574_v46, 0.0 }
  0xcc   : > { %v578_v47 = vsel %vm575_vm7, 1, %v1961_v22 }
 0x127   : > { %v395_v40 = vpop.permute.xlu0 %394 }
 0x128   : > { %v397_v42 = vmul.f32 %v395_v40, %v389_v41 }
 0x12a   : > { %399 = vrot.lane.b32.xlu1 %v397_v42, %s1962_s18 }
 0x12f   : > { %v432_v49 = vpop.permute.xlu0 %431 }
 0x130   : > { %v434_v50 = vmul.f32 %v432_v49, %v426_v48 }
 0x132   : > { %436 = vrot.lane.b32.xlu1 %v434_v50, %s1962_s18 }
 0x137   : > { %v2113_v61 = vpop.permute.xlu0 %452 }
 0x138   : > { %vm2657_vm11 = vcmp.eq.s32.totalorder %v2113_v61, 1 }
 0x13a   : > { %458 = vperm.xlu1 %1658, %v456_v52  }
 0x19c   : > { %v400_v54 = vpop.permute.xlu1 %399 }
 0x19d   : > { %v2105_v55 = vadd.f32 %v400_v54, %v392_v53 }
 0x19f   : > { %1673 = vtanh.f32 %v2105_v55 }
 0x1a4   : > { %v437_v57 = vpop.permute.xlu1 %436 }
 0x1a5   : > { %v1674_v58 = vpop.eup %1673  ;;  %v2108_v59 = vadd.f32 %v437_v57, %v429_v56  ;;  %v576_v57 = vld [vmem:[%s2094_s17 + $0x6] sm:$0x1] }
 0x1a6   : > { %405 = vrot.lane.b32.xlu2 %v1674_v58, %s1963_s19  ;;  %vm577_vm8 = vcmp.gt.f32.partialorder %v576_v57, 0.0 }
 0x1a7   : > { %1675 = vtanh.f32 %v2108_v59 }
 0x1ac   : > { %v2122_v1 = vpop.permute.xlu1 %458 }
 0x1ad   : > { %v1676_v60 = vpop.eup %1675  ;;  %vm2658_vm12 = vcmp.eq.s32.totalorder %v2122_v1, 1 }
 0x1ae   : > { %442 = vrot.lane.b32.xlu2 %v1676_v60, %s1963_s19  ;;  %v2159_v49 = vsel %vm2658_vm12, %v2108_v59, 0.0  ;;  %v584_v59 = vsel %vm577_vm8, 1, %v1961_v22 }
 0x200   : > { %v406_v62 = vpop.permute.xlu2 %405 }
 0x201   : > { %v408_v63 = vmul.f32 %v406_v62, %v389_v41 }
 0x203   : > { %v2118_v0 = vsel %vm2657_vm11, %v408_v63, 0.0 }
 0x204   : > { %465 = vrot.lane.b32.xlu2 %v2118_v0, %s1964_s20 }
 0x208   : > { %v443_v2 = vpop.permute.xlu2 %442 }
 0x209   : > { %v445_v3 = vmul.f32 %v443_v2, %v426_v48  ;;  %v2154_v48 = vsel %vm2657_vm11, %v2105_v55, 0.0 }
 0x20b   : > { %v2127_v4 = vsel %vm2658_vm12, %v445_v3, 0.0 }
 0x20c   : > { %469 = vrot.lane.b32.xlu1 %v2127_v4, %s1963_s19 }
 0x25e   : > { %v2131_v5 = vpop.permute.xlu2 %465 }
 0x27e   : > { %v2133_v6 = vpop.permute.xlu1 %469 }
 0x27f   : > { %v472_v7 = vsel %vm319_vm0, %v2131_v5, %v2133_v6 }
 0x280   : > { %1559 = vmatmul.msk.f32.vlgmr.msra.gmra.mxu2 %vm344_vm13, %v472_v7 }
 0x303   : > { %v493_v8 = vpop.f32.mrf.mxu2 }
 0x304   : > { %v497_v11 = vadd.f32 %v2139_v9, %v493_v8  ;;  %v499_v12 = vadd.f32 %v2141_v10, %v493_v8 }
 0x306   : > { %1677 = vtanh.f32 %v497_v11  ;;  %v1560_v15 = vmul.f32 -1.442695, %v497_v11  ;;  %v1561_v19 = vmul.f32 -1.442695, %v499_v12 }
 0x307   : > { %1679 = vtanh.f32 %v499_v12 }
 0x308   : > { %1681 = vpow2.f32 %v1560_v15  ;;  %v2201_v15 = vld [vmem:[#allocation2 + $0x2] sm:$0x1] }
 0x30c   : > { %v1678_v13 = vpop.eup %1677 }
 0x30d   : > { %v1680_v14 = vpop.eup %1679  ;;  %522 = vrot.lane.b32.xlu2 %v1678_v13, %s1960_s14 }
 0x30e   : > { %559 = vrot.lane.b32.xlu0 %v1680_v14, %s1960_s14  ;;  %v1682_v16 = vpop.eup %1681 }
 0x30f   : > { %v503_v17 = vadd.f32 1.0, %v1682_v16  ;;  %v2203_v16 = vld [vmem:[#allocation2 + $0x5] sm:$0x1] }
 0x311   : > { %1683 = vrcp.f32 %v503_v17  ;;  %v515_v27 = vand.u32 2147483648, %v503_v17  ;;  %vm509_vm15 = vweird.f32 %v503_v17  ;;  %v513_v28 = vand.u32 2147483647, %v503_v17 }
 0x312   : > { %1685 = vpow2.f32 %v1561_v19 }
 0x313   : > { %v516_v30 = vor.u32 1.1754944e-38, %v515_v27  ;;  %vm514_vm2 = vcmp.eq.f32.partialorder %v513_v28, 8.507059e+37 }
 0x317   : > { %v1684_v18 = vpop.eup %1683 }
 0x318   : > { %v505_v20 = vmul.f32 %v1684_v18, %v503_v17  ;;  %v1686_v24 = vpop.eup %1685  ;;  %vm510_vm14 = vweird.f32 %v1684_v18 }
 0x319   : > { %v540_v25 = vadd.f32 1.0, %v1686_v24  ;;  %vm511_vm1 = vmor %vm509_vm15, %vm510_vm14 }
 0x31a   : > { %v506_v21 = vsub.f32 1.0, %v505_v20 }
 0x31b   : > { %1687 = vrcp.f32 %v540_v25  ;;  %v552_v39 = vand.u32 2147483648, %v540_v25  ;;  %vm546_vm4 = vweird.f32 %v540_v25  ;;  %v550_v40 = vand.u32 2147483647, %v540_v25 }
 0x31c   : > { %v507_v23 = vmul.f32 %v1684_v18, %v506_v21 }
 0x31d   : > { %v553_v42 = vor.u32 1.1754944e-38, %v552_v39  ;;  %vm551_vm6 = vcmp.eq.f32.partialorder %v550_v40, 8.507059e+37 }
 0x31e   : > { %v508_v26 = vadd.f32 %v1684_v18, %v507_v23 }
 0x320   : > { %v512_v29 = vsel %vm511_vm1, %v1684_v18, %v508_v26 }
 0x321   : > { %v517_v32 = vsel %vm514_vm2, %v516_v30, %v512_v29  ;;  %v1688_v34 = vpop.eup %1687 }
 0x322   : > { %v542_v35 = vmul.f32 %v1688_v34, %v540_v25  ;;  %vm547_vm3 = vweird.f32 %v1688_v34  ;;  %v520_v50 = vmul.f32 %v517_v32, %v2154_v48 }
 0x323   : > { %vm548_vm5 = vmor %vm546_vm4, %vm547_vm3 }
 0x324   : > { %v543_v36 = vsub.f32 1.0, %v542_v35 }
 0x326   : > { %v544_v37 = vmul.f32 %v1688_v34, %v543_v36 }
 0x328   : > { %v545_v38 = vadd.f32 %v1688_v34, %v544_v37 }
 0x32a   : > { %v549_v41 = vsel %vm548_vm5, %v1688_v34, %v545_v38 }
 0x32b   : > { %v554_v44 = vsel %vm551_vm6, %v553_v42, %v549_v41 }
 0x32c   : > { %v557_v51 = vmul.f32 %v554_v44, %v2159_v49 }
 0x367   : > { %v523_v31 = vpop.permute.xlu2 %522 }
 0x368   : > { %v525_v33 = vmul.f32 %v523_v31, %v517_v32 }
 0x36a   : > { %527 = vrot.lane.b32.xlu1 %v525_v33, %s1962_s18 }
 0x380   : > { %v560_v43 = vpop.permute.xlu0 %559 }
 0x381   : > { %v562_v45 = vmul.f32 %v560_v43, %v554_v44 }
 0x383   : > { %564 = vrot.lane.b32.xlu2 %v562_v45, %s1962_s18 }
 0x38b   : > { %580 = vperm.xlu2 %1659, %v578_v47  }
 0x3dc   : > { %v528_v52 = vpop.permute.xlu1 %527 }
 0x3dd   : > { %v565_v53 = vpop.permute.xlu2 %564  ;;  %v2163_v54 = vadd.f32 %v528_v52, %v520_v50 }
 0x3de   : > { %v2165_v56 = vadd.f32 %v565_v53, %v557_v51  ;;  %v704_v53 = vld [vmem:[%s2094_s17 + $0x2] sm:$0x1] }
 0x3df   : > { %1689 = vtanh.f32 %v2163_v54  ;;  %vm705_vm7 = vcmp.gt.f32.partialorder %v704_v53, 0.0  ;;  %v834_v53 = vld [vmem:[%s2094_s17 + $0x3] sm:$0x1] }
 0x3e0   : > { %1691 = vtanh.f32 %v2165_v56 }
 0x3e5   : > { %v1690_v55 = vpop.eup %1689  ;;  %v2173_v60 = vpop.permute.xlu2 %580 }
 0x3e6   : > { %v1692_v58 = vpop.eup %1691  ;;  %533 = vrot.lane.b32.xlu0 %v1690_v55, %s1963_s19  ;;  %vm582_vm9 = vcmp.eq.s32.totalorder %v2173_v60, 1  ;;  %v708_v55 = vsel %vm705_vm7, 1, %v1961_v22 }
 0x3e7   : > { %570 = vrot.lane.b32.xlu1 %v1692_v58, %s1963_s19  ;;  %v2217_v57 = vsel %vm582_vm9, %v2163_v54, %v2154_v48 }
 0x3ee   : > { %586 = vperm.xlu0 %1657, %v584_v59  }
 0x458   : > { %v534_v62 = vpop.permute.xlu0 %533 }
 0x459   : > { %v2175_v63 = vmul.f32 %v534_v62, %v517_v32  ;;  %v571_v3 = vpop.permute.xlu1 %570 }
 0x45a   : > { %v2186_v7 = vmul.f32 %v571_v3, %v554_v44 }
 0x45b   : > { %v2182_v2 = vsel %vm582_vm9, %v2175_v63, %v2118_v0 }
 0x45c   : > { %595 = vrot.lane.b32.xlu1 %v2182_v2, %s1964_s20 }
 0x460   : > { %v2188_v8 = vpop.permute.xlu0 %586 }
 0x461   : > { %vm588_vm10 = vcmp.eq.s32.totalorder %v2188_v8, 1 }
 0x462   : > { %v2195_v11 = vsel %vm588_vm10, %v2186_v7, %v2127_v4  ;;  %v2230_v48 = vsel %vm588_vm10, %v2165_v56, %v2159_v49 }
 0x463   : > { %599 = vrot.lane.b32.xlu2 %v2195_v11, %s1963_s19 }
 0x4bd   : > { %v600_v0 = vpop.permute.xlu2 %599 }
 0x4ce   : > { %v596_v12 = vpop.permute.xlu1 %595 }
 0x4cf   : > { %v602_v13 = vsel %vm319_vm0, %v596_v12, %v600_v0  ;;  %v706_v0 = vld [vmem:[%s2094_s17 + $0x5] sm:$0x1] }
 0x4d0   : > { %1562 = vmatmul.msk.f32.vlgmr.msra.gmra.mxu3 %vm344_vm13, %v602_v13  ;;  %vm707_vm8 = vcmp.gt.f32.partialorder %v706_v0, 0.0 }
 0x4d1   : > { %v714_v12 = vsel %vm707_vm8, 1, %v1961_v22 }
 0x553   : > { %v623_v14 = vpop.f32.mrf.mxu3 }
 0x554   : > { %v627_v17 = vadd.f32 %v2201_v15, %v623_v14  ;;  %v629_v18 = vadd.f32 %v2203_v16, %v623_v14 }
 0x556   : > { %1693 = vtanh.f32 %v627_v17  ;;  %v1563_v20 = vmul.f32 -1.442695, %v627_v17  ;;  %v1564_v21 = vmul.f32 -1.442695, %v629_v18 }
 0x557   : > { %1695 = vtanh.f32 %v629_v18 }
 0x558   : > { %1697 = vpow2.f32 %v1563_v20 }
 0x559   : > { %1699 = vpow2.f32 %v1564_v21 }
 0x55c   : > { %v1694_v4 = vpop.eup %1693 }
 0x55d   : > { %v1696_v19 = vpop.eup %1695  ;;  %652 = vrot.lane.b32.xlu0 %v1694_v4, %s1960_s14 }
 0x55e   : > { %689 = vrot.lane.b32.xlu1 %v1696_v19, %s1960_s14  ;;  %v1698_v23 = vpop.eup %1697 }
 0x55f   : > { %v1700_v24 = vpop.eup %1699  ;;  %v633_v25 = vadd.f32 1.0, %v1698_v23 }
 0x560   : > { %v670_v26 = vadd.f32 1.0, %v1700_v24 }
 0x561   : > { %1701 = vrcp.f32 %v633_v25  ;;  %v645_v37 = vand.u32 2147483648, %v633_v25  ;;  %vm639_vm1 = vweird.f32 %v633_v25  ;;  %v643_v39 = vand.u32 2147483647, %v633_v25 }
 0x562   : > { %1703 = vrcp.f32 %v670_v26  ;;  %v682_v38 = vand.u32 2147483648, %v670_v26  ;;  %vm676_vm2 = vweird.f32 %v670_v26  ;;  %v680_v40 = vand.u32 2147483647, %v670_v26 }
 0x563   : > { %v646_v43 = vor.u32 1.1754944e-38, %v645_v37  ;;  %vm644_vm5 = vcmp.eq.f32.partialorder %v643_v39, 8.507059e+37 }
 0x564   : > { %v683_v44 = vor.u32 1.1754944e-38, %v682_v38  ;;  %vm681_vm6 = vcmp.eq.f32.partialorder %v680_v40, 8.507059e+37 }
 0x567   : > { %v1702_v27 = vpop.eup %1701 }
 0x568   : > { %v1704_v28 = vpop.eup %1703  ;;  %v635_v29 = vmul.f32 %v1702_v27, %v633_v25  ;;  %vm640_vm14 = vweird.f32 %v1702_v27 }
 0x569   : > { %v672_v30 = vmul.f32 %v1704_v28, %v670_v26  ;;  %vm677_vm15 = vweird.f32 %v1704_v28  ;;  %vm641_vm3 = vmor %vm639_vm1, %vm640_vm14 }
 0x56a   : > { %v636_v31 = vsub.f32 1.0, %v635_v29  ;;  %vm678_vm4 = vmor %vm676_vm2, %vm677_vm15 }
 0x56b   : > { %v673_v32 = vsub.f32 1.0, %v672_v30 }
 0x56c   : > { %v637_v33 = vmul.f32 %v1702_v27, %v636_v31 }
 0x56d   : > { %v674_v34 = vmul.f32 %v1704_v28, %v673_v32 }
 0x56e   : > { %v638_v35 = vadd.f32 %v1702_v27, %v637_v33 }
 0x56f   : > { %v675_v36 = vadd.f32 %v1704_v28, %v674_v34 }
 0x570   : > { %v642_v41 = vsel %vm641_vm3, %v1702_v27, %v638_v35  ;;  %v2265_v27 = vld [vmem:[#allocation2 + $0x3] sm:$0x1] }
 0x571   : > { %v679_v42 = vsel %vm678_vm4, %v1704_v28, %v675_v36  ;;  %v647_v46 = vsel %vm644_vm5, %v646_v43, %v642_v41  ;;  %v2267_v28 = vld [vmem:[#allocation2 + $0x4] sm:$0x1]  ;;  %vm835_vm5 = vcmp.gt.f32.partialorder %v834_v53, 0.0 }
 0x572   : > { %v684_v50 = vsel %vm681_vm6, %v683_v44, %v679_v42  ;;  %v650_v58 = vmul.f32 %v647_v46, %v2217_v57 }
 0x573   : > { %v687_v54 = vmul.f32 %v684_v50, %v2230_v48 }
 0x5cf   : > { %v653_v45 = vpop.permute.xlu0 %652 }
 0x5d0   : > { %v690_v47 = vpop.permute.xlu1 %689  ;;  %v655_v51 = vmul.f32 %v653_v45, %v647_v46 }
 0x5d1   : > { %v692_v52 = vmul.f32 %v690_v47, %v684_v50 }
 0x5d2   : > { %657 = vrot.lane.b32.xlu2 %v655_v51, %s1962_s18 }
 0x5d3   : > { %694 = vrot.lane.b32.xlu0 %v692_v52, %s1962_s18 }
 0x5db   : > { %710 = vperm.xlu0 %1657, %v708_v55  }
 0x62c   : > { %v658_v59 = vpop.permute.xlu2 %657 }
 0x62d   : > { %v2220_v62 = vadd.f32 %v658_v59, %v650_v58  ;;  %v838_v58 = vsel %vm835_vm5, 1, %v1961_v22 }
 0x62f   : > { %1705 = vtanh.f32 %v2220_v62 }
 0x635   : > { %v1706_v3 = vpop.eup %1705 }
 0x636   : > { %663 = vrot.lane.b32.xlu1 %v1706_v3, %s1963_s19 }
 0x63e   : > { %716 = vperm.xlu1 %1658, %v714_v12  }
 0x645   : > { %v695_v13 = vpop.permute.xlu0 %694 }
 0x646   : > { %v2233_v14 = vadd.f32 %v695_v13, %v687_v54 }
 0x648   : > { %1707 = vtanh.f32 %v2233_v14 }
 0x64d   : > { %v2237_v18 = vpop.permute.xlu0 %710 }
 0x64e   : > { %v1708_v17 = vpop.eup %1707  ;;  %vm712_vm14 = vcmp.eq.s32.totalorder %v2237_v18, 1 }
 0x64f   : > { %700 = vrot.lane.b32.xlu2 %v1708_v17, %s1963_s19 }
 0x6a8   : > { %v664_v4 = vpop.permute.xlu1 %663 }
 0x6a9   : > { %v2239_v19 = vmul.f32 %v664_v4, %v647_v46  ;;  %v701_v56 = vpop.permute.xlu2 %700 }
 0x6aa   : > { %v2250_v20 = vmul.f32 %v701_v56, %v684_v50 }
 0x6ab   : > { %v2246_v49 = vsel %vm712_vm14, %v2239_v19, %v2182_v2 }
 0x6ac   : > { %725 = vrot.lane.b32.xlu2 %v2246_v49, %s1964_s20 }
 0x6b0   : > { %v2252_v21 = vpop.permute.xlu1 %716 }
 0x6b1   : > { %vm718_vm15 = vcmp.eq.s32.totalorder %v2252_v21, 1 }
 0x6b2   : > { %v2259_v23 = vsel %vm718_vm15, %v2250_v20, %v2195_v11  ;;  %v719_v18 = vsel %vm718_vm15, %v2250_v20, 0.0 }
 0x6b3   : > { %729 = vrot.lane.b32.xlu0 %v2259_v23, %s1963_s19 }
 0x706   : > { %v726_v2 = vpop.permute.xlu2 %725 }
 0x725   : > { %v730_v24 = vpop.permute.xlu0 %729 }
 0x726   : > { %v732_v25 = vsel %vm319_vm0, %v726_v2, %v730_v24  ;;  %v2281_v24 = vsel %vm718_vm15, %v2233_v14, %v2230_v48 }
 0x727   : > { %1565 = vmatmul.msk.f32.vlgmr.msrb.gmra.mxu0 %vm344_vm13, %v732_v25 }
 0x7a4   : > { %v753_v26 = vpop.f32.mrf.mxu0 }
 0x7a5   : > { %v757_v29 = vadd.f32 %v2265_v27, %v753_v26  ;;  %v759_v30 = vadd.f32 %v2267_v28, %v753_v26 }
 0x7a7   : > { %1709 = vtanh.f32 %v757_v29  ;;  %v1567_v32 = vmul.f32 -1.442695, %v759_v30  ;;  %v1566_v36 = vmul.f32 -1.442695, %v757_v29 }
 0x7a8   : > { %1711 = vtanh.f32 %v759_v30 }
 0x7a9   : > { %1713 = vpow2.f32 %v1567_v32 }
 0x7ad   : > { %v1710_v11 = vpop.eup %1709 }
 0x7ae   : > { %v1712_v31 = vpop.eup %1711  ;;  %782 = vrot.lane.b32.xlu1 %v1710_v11, %s1960_s14  ;;  %v2292_v11 = vsel %vm712_vm14, %v2220_v62, %v2217_v57 }
 0x7af   : > { %819 = vrot.lane.b32.xlu2 %v1712_v31, %s1960_s14  ;;  %v1714_v33 = vpop.eup %1713 }
 0x7b0   : > { %v800_v34 = vadd.f32 1.0, %v1714_v33  ;;  %v836_v33 = vld [vmem:[%s2094_s17 + $0x4] sm:$0x1]  ;;  %s1410_s17 = sshll.u32 %s1406_s12, 4  ;;  %s1871_s12 = scalar_lea.hbm %s2655_s5, 16  ;;  %s1411_s17 = int_to_ptr.hbm [resolvable:$true] %s1410_s17 }
 0x7b1   : > { %s1865_s28 = sshra.s32 %s1411_s17, 4  ;;  %s1866_s28 = int_to_ptr.hbm [resolvable:$true] %s1865_s28 }
 0x7b2   : > { %1715 = vrcp.f32 %v800_v34  ;;  %v812_v43 = vand.u32 2147483648, %v800_v34  ;;  %vm806_vm2 = vweird.f32 %v800_v34  ;;  %v810_v44 = vand.u32 2147483647, %v800_v34  ;;  %s1867_s9 = scalar_lea.hbm %s1866_s28, 8  ;;  %p1872_p3 = scmp.lt.s32.totalorder %s1866_s28, %s2655_s5 }
 0x7b3   : > { %1717 = vpow2.f32 %v1566_v36  ;;  %p1868_p0 = scmp.ne.s32.totalorder %s1866_s28, %s1867_s9  ;;  %p1873_p4 = scmp.lt.s32.totalorder %s1871_s12, %s1867_s9 }
 0x7b4   : > { %v813_v46 = vor.u32 1.1754944e-38, %v812_v43  ;;  %vm811_vm4 = vcmp.eq.f32.partialorder %v810_v44, 8.507059e+37 }
 0x7b5   : > { %p1869_p1 = pnand %p1868_p0, %p2038_p5  ;;  %p1874_p7 = por %p1873_p4, %p1872_p3 }
 0x7b7   : > { %p1870_p2 = pneg %p1869_p1 }
 0x7b8   : > { %v1716_v35 = vpop.eup %1715 }
 0x7b9   : > { %v802_v37 = vmul.f32 %v1716_v35, %v800_v34  ;;  %v1718_v39 = vpop.eup %1717  ;;  %vm807_vm1 = vweird.f32 %v1716_v35  ;;  %p1875_p8 = pnand %p1874_p7, %p1870_p2 }
 0x7ba   : > { %v763_v41 = vadd.f32 1.0, %v1718_v39  ;;  %vm808_vm3 = vmor %vm806_vm2, %vm807_vm1  ;;  %vm837_vm2 = vcmp.gt.f32.partialorder %v836_v33, 0.0 }
 0x7bb   : > { %v803_v38 = vsub.f32 1.0, %v802_v37  ;;  %v844_v34 = vsel %vm837_vm2, 1, %v1961_v22 }
 0x7bc   : > { %1719 = vrcp.f32 %v763_v41  ;;  %v775_v12 = vand.u32 2147483648, %v763_v41  ;;  %vm769_vm7 = vweird.f32 %v763_v41  ;;  %v773_v54 = vand.u32 2147483647, %v763_v41 }
 0x7bd   : > { %v804_v40 = vmul.f32 %v1716_v35, %v803_v38 }
 0x7be   : > { %v776_v17 = vor.u32 1.1754944e-38, %v775_v12  ;;  %vm774_vm1 = vcmp.eq.f32.partialorder %v773_v54, 8.507059e+37 }
 0x7bf   : > { %v805_v42 = vadd.f32 %v1716_v35, %v804_v40 }
 0x7c1   : > { %v809_v45 = vsel %vm808_vm3, %v1716_v35, %v805_v42 }
 0x7c2   : > { %v814_v50 = vsel %vm811_vm4, %v813_v46, %v809_v45  ;;  %v1720_v51 = vpop.eup %1719 }
 0x7c3   : > { %v765_v55 = vmul.f32 %v1720_v51, %v763_v41  ;;  %vm770_vm6 = vweird.f32 %v1720_v51  ;;  %v817_v25 = vmul.f32 %v814_v50, %v2281_v24 }
 0x7c4   : > { %vm771_vm8 = vmor %vm769_vm7, %vm770_vm6 }
 0x7c5   : > { %v766_v59 = vsub.f32 1.0, %v765_v55 }
 0x7c7   : > { %v767_v3 = vmul.f32 %v1720_v51, %v766_v59 }
 0x7c9   : > { %v768_v0 = vadd.f32 %v1720_v51, %v767_v3 }
 0x7cb   : > { %v772_v13 = vsel %vm771_vm8, %v1720_v51, %v768_v0 }
 0x7cc   : > { %v777_v56 = vsel %vm774_vm1, %v776_v17, %v772_v13 }
 0x7cd   : > { %v780_v31 = vmul.f32 %v777_v56, %v2292_v11 }
 0x809   : > { %v820_v47 = vpop.permute.xlu2 %819 }
 0x80a   : > { %v822_v52 = vmul.f32 %v820_v47, %v814_v50 }
 0x80c   : > { %824 = vrot.lane.b32.xlu1 %v822_v52, %s1962_s18 }
 0x814   : > { %840 = vperm.xlu1 %1658, %v838_v58  }
 0x820   : > { %v783_v4 = vpop.permute.xlu1 %782 }
 0x821   : > { %v785_v2 = vmul.f32 %v783_v4, %v777_v56 }
 0x823   : > { %787 = vrot.lane.b32.xlu0 %v785_v2, %s1962_s18 }
 0x87e   : > { %v825_v26 = vpop.permute.xlu1 %824 }
 0x87f   : > { %v2284_v29 = vadd.f32 %v825_v26, %v817_v25 }
 0x881   : > { %1721 = vtanh.f32 %v2284_v29 }
 0x886   : > { %v2301_v35 = vpop.permute.xlu1 %840 }
 0x887   : > { %v1722_v30 = vpop.eup %1721  ;;  %vm842_vm3 = vcmp.eq.s32.totalorder %v2301_v35, 1 }
 0x888   : > { %830 = vrot.lane.b32.xlu0 %v1722_v30, %s1963_s19 }
 0x895   : > { %v788_v48 = vpop.permute.xlu0 %787 }
 0x896   : > { %v2295_v14 = vadd.f32 %v788_v48, %v780_v31 }
 0x898   : > { %1723 = vtanh.f32 %v2295_v14 }
 0x89e   : > { %v1724_v32 = vpop.eup %1723 }
 0x89f   : > { %793 = vrot.lane.b32.xlu2 %v1724_v32, %s1963_s19 }
 0x8a7   : > { %846 = vperm.xlu2 %1659, %v844_v34  }
 0x8f9   : > { %v794_v36 = vpop.permute.xlu2 %793 }
 0x8fa   : > { %v2303_v57 = vmul.f32 %v794_v36, %v777_v56  ;;  %v831_v37 = vpop.permute.xlu0 %830 }
 0x8fb   : > { %v2314_v38 = vmul.f32 %v831_v37, %v814_v50 }
 0x8fc   : > { %v2310_v62 = vsel %vm842_vm3, %v2303_v57, %v2246_v49 }
 0x8fd   : > { %855 = vrot.lane.b32.xlu0 %v2310_v62, %s1964_s20 }
 0x901   : > { %v2316_v22 = vpop.permute.xlu2 %846 }
 0x902   : > { %vm848_vm4 = vcmp.eq.s32.totalorder %v2316_v22, 1 }
 0x903   : > { %v2323_v39 = vsel %vm848_vm4, %v2314_v38, %v2259_v23 }
 0x904   : > { %859 = vrot.lane.b32.xlu1 %v2323_v39, %s1963_s19 }
 0x96f   : > { %v856_v49 = vpop.permute.xlu0 %855 }
 0x976   : > { %v860_v40 = vpop.permute.xlu1 %859 }
 0x977   : > { %v862_v41 = vsel %vm319_vm0, %v856_v49, %v860_v40  ;;  %v2339_v49 = vsel %vm842_vm3, %v2295_v14, %v2292_v11  ;;  %v2345_v40 = vsel %vm848_vm4, %v2284_v29, %v2281_v24 }
 0x978   : > { %1568 = vmatmul.msk.f32.vlgmr.msrb.gmra.mxu1 %vm344_vm13, %v862_v41 }
 0x9f5   : > { %v883_v42 = vpop.f32.mrf.mxu1 }
 0x9f6   : > { %v886_v43 = vadd.f32 %v883_v42, %v2267_v28  ;;  %v887_v44 = vadd.f32 %v883_v42, %v2265_v27 }
 0x9f8   : > { %1725 = vtanh.f32 %v886_v43  ;;  %v1569_v23 = vmul.f32 -1.442695, %v886_v43  ;;  %v1570_v52 = vmul.f32 -1.442695, %v887_v44 }
 0x9f9   : > { %1727 = vtanh.f32 %v887_v44 }
 0x9fa   : > { %1729 = vpow2.f32 %v1569_v23 }
 0x9fe   : > { %v1726_v45 = vpop.eup %1725 }
 0x9ff   : > { %v1728_v46 = vpop.eup %1727  ;;  %910 = vrot.lane.b32.xlu2 %v1726_v45, %s1960_s14 }
 0xa00   : > { %947 = vrot.lane.b32.xlu0 %v1728_v46, %s1960_s14  ;;  %v1730_v47 = vpop.eup %1729 }
 0xa01   : > { %v891_v50 = vadd.f32 1.0, %v1730_v47 }
 0xa03   : > { %1731 = vrcp.f32 %v891_v50  ;;  %v903_v3 = vand.u32 2147483648, %v891_v50  ;;  %vm897_vm6 = vweird.f32 %v891_v50  ;;  %v901_v0 = vand.u32 2147483647, %v891_v50 }
 0xa04   : > { %1733 = vpow2.f32 %v1570_v52 }
 0xa05   : > { %v904_v54 = vor.u32 1.1754944e-38, %v903_v3  ;;  %vm902_vm8 = vcmp.eq.f32.partialorder %v901_v0, 8.507059e+37 }
 0xa09   : > { %v1732_v51 = vpop.eup %1731 }
 0xa0a   : > { %v893_v53 = vmul.f32 %v1732_v51, %v891_v50  ;;  %v1734_v27 = vpop.eup %1733  ;;  %vm898_vm5 = vweird.f32 %v1732_v51 }
 0xa0b   : > { %v928_v58 = vadd.f32 1.0, %v1734_v27  ;;  %vm899_vm7 = vmor %vm897_vm6, %vm898_vm5 }
 0xa0c   : > { %v894_v28 = vsub.f32 1.0, %v893_v53 }
 0xa0d   : > { %1735 = vrcp.f32 %v928_v58  ;;  %v940_v31 = vand.u32 2147483648, %v928_v58  ;;  %vm934_vm2 = vweird.f32 %v928_v58  ;;  %v938_v48 = vand.u32 2147483647, %v928_v58 }
 0xa0e   : > { %v895_v55 = vmul.f32 %v1732_v51, %v894_v28 }
 0xa0f   : > { %v941_v33 = vor.u32 1.1754944e-38, %v940_v31  ;;  %vm939_vm5 = vcmp.eq.f32.partialorder %v938_v48, 8.507059e+37 }
 0xa10   : > { %v896_v59 = vadd.f32 %v1732_v51, %v895_v55 }
 0xa12   : > { %v900_v12 = vsel %vm899_vm7, %v1732_v51, %v896_v59 }
 0xa13   : > { %v905_v17 = vsel %vm902_vm8, %v904_v54, %v900_v12  ;;  %v1736_v56 = vpop.eup %1735 }
 0xa14   : > { %v930_v2 = vmul.f32 %v1736_v56, %v928_v58  ;;  %vm935_vm1 = vweird.f32 %v1736_v56  ;;  %v908_v41 = vmul.f32 %v905_v17, %v2339_v49 }
 0xa15   : > { %vm936_vm11 = vmor %vm934_vm2, %vm935_vm1 }
 0xa16   : > { %v931_v25 = vsub.f32 1.0, %v930_v2 }
 0xa18   : > { %v932_v26 = vmul.f32 %v1736_v56, %v931_v25 }
 0xa1a   : > { %v933_v30 = vadd.f32 %v1736_v56, %v932_v26 }
 0xa1c   : > { %v937_v32 = vsel %vm936_vm11, %v1736_v56, %v933_v30 }
 0xa1d   : > { %v942_v36 = vsel %vm939_vm5, %v941_v33, %v937_v32 }
 0xa1e   : > { %v945_v42 = vmul.f32 %v942_v36, %v2345_v40 }
 0xa59   : > { %v911_v13 = vpop.permute.xlu2 %910 }
 0xa5a   : > { %v913_v4 = vmul.f32 %v911_v13, %v905_v17 }
 0xa5c   : > { %915 = vrot.lane.b32.xlu1 %v913_v4, %s1962_s18 }
 0xa72   : > { %v948_v34 = vpop.permute.xlu0 %947 }
 0xa73   : > { %v950_v37 = vmul.f32 %v948_v34, %v942_v36 }
 0xa75   : > { %952 = vrot.lane.b32.xlu2 %v950_v37, %s1962_s18 }
 0xace   : > { %v916_v43 = vpop.permute.xlu1 %915 }
 0xacf   : > { %v953_v44 = vpop.permute.xlu2 %952  ;;  %v2349_v45 = vadd.f32 %v916_v43, %v908_v41 }
 0xad0   : > { %v2351_v46 = vadd.f32 %v953_v44, %v945_v42 }
 0xad1   : > { %1737 = vtanh.f32 %v2349_v45 }
 0xad2   : > { %1739 = vtanh.f32 %v2351_v46 }
 0xad7   : > { %v1738_v11 = vpop.eup %1737 }
 0xad8   : > { %v1740_v14 = vpop.eup %1739  ;;  %921 = vrot.lane.b32.xlu0 %v1738_v11, %s1963_s19 }
 0xad9   : > { %958 = vrot.lane.b32.xlu1 %v1740_v14, %s1963_s19 }
 0xb4a   : > { %v922_v24 = vpop.permute.xlu0 %921 }
 0xb4b   : > { %v959_v29 = vpop.permute.xlu1 %958  ;;  %v2357_v23 = vmul.f32 %v922_v24, %v905_v17 }
 0xb4c   : > { %v2359_v47 = vmul.f32 %v959_v29, %v942_v36 }
 0xb4d   : > { %v2365_v50 = vsel %vm848_vm4, %v2357_v23, %v2310_v62  ;;  %v962_v60 = vsel %vm848_vm4, %v2357_v23, 0.0 }
 0xb4e   : > { %v2371_v51 = vsel %vm842_vm3, %v2359_v47, %v2323_v39  ;;  %969 = vrot.lane.b32.xlu2 %v2365_v50, %s1964_s20 }
 0xb4f   : > { %973 = vrot.lane.b32.xlu0 %v2371_v51, %s1963_s19 }
 0xba8   : > { %v970_v52 = vpop.permute.xlu2 %969 }
 0xbc1   : > { %v974_v53 = vpop.permute.xlu0 %973 }
 0xbc2   : > { %v976_v28 = vsel %vm319_vm0, %v970_v52, %v974_v53  ;;  %v2389_v52 = vsel %vm842_vm3, %v2351_v46, %v2345_v40 }
 0xbc3   : > { %1571 = vmatmul.msk.f32.vlgmr.msrb.gmra.mxu2 %vm344_vm13, %v976_v28 }
 0xc46   : > { %v997_v62 = vpop.f32.mrf.mxu2 }
 0xc47   : > { %v1000_v55 = vadd.f32 %v997_v62, %v2203_v16  ;;  %v1001_v27 = vadd.f32 %v997_v62, %v2201_v15 }
 0xc49   : > { %1741 = vtanh.f32 %v1000_v55  ;;  %v1573_v59 = vmul.f32 -1.442695, %v1001_v27  ;;  %v1572_v54 = vmul.f32 -1.442695, %v1000_v55 }
 0xc4a   : > { %1743 = vtanh.f32 %v1001_v27  ;;  %v2400_v27 = vsel %vm848_vm4, %v2349_v45, %v2339_v49 }
 0xc4b   : > { %1745 = vpow2.f32 %v1573_v59 }
 0xc4f   : > { %v1742_v39 = vpop.eup %1741 }
 0xc50   : > { %v1744_v58 = vpop.eup %1743  ;;  %1024 = vrot.lane.b32.xlu1 %v1742_v39, %s1960_s14 }
 0xc51   : > { %1061 = vrot.lane.b32.xlu2 %v1744_v58, %s1960_s14  ;;  %v1746_v3 = vpop.eup %1745 }
 0xc52   : > { %v1042_v0 = vadd.f32 1.0, %v1746_v3 }
 0xc54   : > { %1747 = vrcp.f32 %v1042_v0  ;;  %v1054_v2 = vand.u32 2147483648, %v1042_v0  ;;  %vm1048_vm6 = vweird.f32 %v1042_v0  ;;  %v1052_v25 = vand.u32 2147483647, %v1042_v0 }
 0xc55   : > { %1749 = vpow2.f32 %v1572_v54 }
 0xc56   : > { %v1055_v30 = vor.u32 1.1754944e-38, %v1054_v2  ;;  %vm1053_vm8 = vcmp.eq.f32.partialorder %v1052_v25, 8.507059e+37 }
 0xc5a   : > { %v1748_v12 = vpop.eup %1747 }
 0xc5b   : > { %v1044_v13 = vmul.f32 %v1748_v12, %v1042_v0  ;;  %v1750_v17 = vpop.eup %1749  ;;  %vm1049_vm11 = vweird.f32 %v1748_v12 }
 0xc5c   : > { %v1005_v4 = vadd.f32 1.0, %v1750_v17  ;;  %vm1050_vm7 = vmor %vm1048_vm6, %vm1049_vm11 }
 0xc5d   : > { %v1045_v16 = vsub.f32 1.0, %v1044_v13 }
 0xc5e   : > { %1751 = vrcp.f32 %v1005_v4  ;;  %v1017_v42 = vand.u32 2147483648, %v1005_v4  ;;  %vm1011_vm2 = vweird.f32 %v1005_v4  ;;  %v1015_v43 = vand.u32 2147483647, %v1005_v4 }
 0xc5f   : > { %v1046_v15 = vmul.f32 %v1748_v12, %v1045_v16 }
 0xc60   : > { %v1018_v11 = vor.u32 1.1754944e-38, %v1017_v42  ;;  %vm1016_vm11 = vcmp.eq.f32.partialorder %v1015_v43, 8.507059e+37 }
 0xc61   : > { %v1047_v56 = vadd.f32 %v1748_v12, %v1046_v15 }
 0xc63   : > { %v1051_v26 = vsel %vm1050_vm7, %v1748_v12, %v1047_v56 }
 0xc64   : > { %v1056_v48 = vsel %vm1053_vm8, %v1055_v30, %v1051_v26  ;;  %v1752_v32 = vpop.eup %1751 }
 0xc65   : > { %v1007_v34 = vmul.f32 %v1752_v32, %v1005_v4  ;;  %vm1012_vm1 = vweird.f32 %v1752_v32  ;;  %v1059_v53 = vmul.f32 %v1056_v48, %v2389_v52 }
 0xc66   : > { %vm1013_vm5 = vmor %vm1011_vm2, %vm1012_vm1 }
 0xc67   : > { %v1008_v36 = vsub.f32 1.0, %v1007_v34 }
 0xc69   : > { %v1009_v37 = vmul.f32 %v1752_v32, %v1008_v36 }
 0xc6b   : > { %v1010_v41 = vadd.f32 %v1752_v32, %v1009_v37 }
 0xc6d   : > { %v1014_v44 = vsel %vm1013_vm5, %v1752_v32, %v1010_v41 }
 0xc6e   : > { %v1019_v24 = vsel %vm1016_vm11, %v1018_v11, %v1014_v44 }
 0xc6f   : > { %v1022_v39 = vmul.f32 %v1019_v24, %v2400_v27 }
 0xcab   : > { %v1062_v31 = vpop.permute.xlu2 %1061 }
 0xcac   : > { %v1064_v33 = vmul.f32 %v1062_v31, %v1056_v48 }
 0xcae   : > { %1066 = vrot.lane.b32.xlu1 %v1064_v33, %s1962_s18 }
 0xcc2   : > { %v1025_v14 = vpop.permute.xlu1 %1024 }
 0xcc3   : > { %v1027_v29 = vmul.f32 %v1025_v14, %v1019_v24 }
 0xcc5   : > { %1029 = vrot.lane.b32.xlu0 %v1027_v29, %s1962_s18 }
 0xd20   : > { %v1067_v28 = vpop.permute.xlu1 %1066 }
 0xd21   : > { %v2392_v62 = vadd.f32 %v1067_v28, %v1059_v53 }
 0xd23   : > { %1753 = vtanh.f32 %v2392_v62 }
 0xd29   : > { %v1754_v55 = vpop.eup %1753 }
 0xd2a   : > { %1072 = vrot.lane.b32.xlu0 %v1754_v55, %s1963_s19 }
 0xd37   : > { %v1030_v40 = vpop.permute.xlu0 %1029 }
 0xd38   : > { %v2403_v46 = vadd.f32 %v1030_v40, %v1022_v39 }
 0xd3a   : > { %1755 = vtanh.f32 %v2403_v46 }
 0xd40   : > { %v1756_v58 = vpop.eup %1755 }
 0xd41   : > { %1035 = vrot.lane.b32.xlu2 %v1756_v58, %s1963_s19 }
 0xd9b   : > { %v1036_v59 = vpop.permute.xlu2 %1035 }
 0xd9c   : > { %v1073_v3 = vpop.permute.xlu0 %1072  ;;  %v2407_v0 = vmul.f32 %v1036_v59, %v1019_v24 }
 0xd9d   : > { %v2409_v12 = vmul.f32 %v1073_v3, %v1056_v48 }
 0xd9e   : > { %v2415_v49 = vsel %vm718_vm15, %v2407_v0, %v2365_v50 }
 0xd9f   : > { %v2421_v45 = vsel %vm712_vm14, %v2409_v12, %v2371_v51  ;;  %1083 = vrot.lane.b32.xlu1 %v2415_v49, %s1964_s20 }
 0xda0   : > { %1087 = vrot.lane.b32.xlu2 %v2421_v45, %s1963_s19 }
 0xdfa   : > { %v1088_v54 = vpop.permute.xlu2 %1087 }
 0xe11   : > { %v1084_v13 = vpop.permute.xlu1 %1083 }
 0xe12   : > { %v1090_v16 = vsel %vm319_vm0, %v1084_v13, %v1088_v54  ;;  %v2439_v54 = vsel %vm718_vm15, %v2403_v46, %v2400_v27 }
 0xe13   : > { %1574 = vmatmul.msk.f32.vlgmr.msrb.gmra.mxu3 %vm344_vm13, %v1090_v16 }
 0xe96   : > { %v1111_v50 = vpop.f32.mrf.mxu3 }
 0xe97   : > { %v1114_v17 = vadd.f32 %v1111_v50, %v2141_v10  ;;  %v1115_v15 = vadd.f32 %v1111_v50, %v2139_v9 }
 0xe99   : > { %1757 = vtanh.f32 %v1114_v17  ;;  %v1575_v56 = vmul.f32 -1.442695, %v1114_v17  ;;  %v1576_v2 = vmul.f32 -1.442695, %v1115_v15 }
 0xe9a   : > { %1759 = vtanh.f32 %v1115_v15  ;;  %v2450_v15 = vsel %vm712_vm14, %v2392_v62, %v2389_v52 }
 0xe9b   : > { %1761 = vpow2.f32 %v1575_v56 }
 0xe9c   : > { %1763 = vpow2.f32 %v1576_v2 }
 0xe9f   : > { %v1758_v51 = vpop.eup %1757 }
 0xea0   : > { %v1760_v4 = vpop.eup %1759  ;;  %1138 = vrot.lane.b32.xlu0 %v1758_v51, %s1960_s14 }
 0xea1   : > { %1175 = vrot.lane.b32.xlu1 %v1760_v4, %s1960_s14  ;;  %v1762_v25 = vpop.eup %1761 }
 0xea2   : > { %v1764_v26 = vpop.eup %1763  ;;  %v1119_v30 = vadd.f32 1.0, %v1762_v25 }
 0xea3   : > { %v1156_v31 = vadd.f32 1.0, %v1764_v26 }
 0xea4   : > { %1765 = vrcp.f32 %v1119_v30  ;;  %v1131_v43 = vand.u32 2147483648, %v1119_v30  ;;  %vm1125_vm8 = vweird.f32 %v1119_v30  ;;  %v1129_v11 = vand.u32 2147483647, %v1119_v30 }
 0xea5   : > { %1767 = vrcp.f32 %v1156_v31  ;;  %v1168_v44 = vand.u32 2147483648, %v1156_v31  ;;  %vm1162_vm1 = vweird.f32 %v1156_v31  ;;  %v1166_v14 = vand.u32 2147483647, %v1156_v31 }
 0xea6   : > { %v1132_v53 = vor.u32 1.1754944e-38, %v1131_v43  ;;  %vm1130_vm11 = vcmp.eq.f32.partialorder %v1129_v11, 8.507059e+37 }
 0xea7   : > { %v1169_v28 = vor.u32 1.1754944e-38, %v1168_v44  ;;  %vm1167_vm12 = vcmp.eq.f32.partialorder %v1166_v14, 8.507059e+37 }
 0xeaa   : > { %v1766_v10 = vpop.eup %1765 }
 0xeab   : > { %v1768_v9 = vpop.eup %1767  ;;  %v1121_v48 = vmul.f32 %v1766_v10, %v1119_v30  ;;  %vm1126_vm6 = vweird.f32 %v1766_v10 }
 0xeac   : > { %v1158_v32 = vmul.f32 %v1768_v9, %v1156_v31  ;;  %vm1163_vm7 = vweird.f32 %v1768_v9  ;;  %vm1127_vm2 = vmor %vm1125_vm8, %vm1126_vm6 }
 0xead   : > { %v1122_v33 = vsub.f32 1.0, %v1121_v48  ;;  %vm1164_vm5 = vmor %vm1162_vm1, %vm1163_vm7 }
 0xeae   : > { %v1159_v34 = vsub.f32 1.0, %v1158_v32  ;;  %v1790_v32 = vld [vmem:[#allocation2] sm:$0x1] }
 0xeaf   : > { %v1123_v36 = vmul.f32 %v1766_v10, %v1122_v33 }
 0xeb0   : > { %v1160_v37 = vmul.f32 %v1768_v9, %v1159_v34 }
 0xeb1   : > { %v1124_v41 = vadd.f32 %v1766_v10, %v1123_v36 }
 0xeb2   : > { %v1161_v42 = vadd.f32 %v1768_v9, %v1160_v37 }
 0xeb3   : > { %v1128_v24 = vsel %vm1127_vm2, %v1766_v10, %v1124_v41 }
 0xeb4   : > { %v1165_v29 = vsel %vm1164_vm5, %v1768_v9, %v1161_v42  ;;  %v1133_v39 = vsel %vm1130_vm11, %v1132_v53, %v1128_v24  ;;  %v1789_v9 = vld [vmem:[#allocation2 + $0x7] sm:$0x1] }
 0xeb5   : > { %v1170_v58 = vsel %vm1167_vm12, %v1169_v28, %v1165_v29  ;;  %v1136_v13 = vmul.f32 %v1133_v39, %v2439_v54 }
 0xeb6   : > { %v1173_v51 = vmul.f32 %v1170_v58, %v2450_v15 }
 0xf12   : > { %v1139_v55 = vpop.permute.xlu0 %1138 }
 0xf13   : > { %v1176_v40 = vpop.permute.xlu1 %1175  ;;  %v1141_v59 = vmul.f32 %v1139_v55, %v1133_v39 }
 0xf14   : > { %v1178_v3 = vmul.f32 %v1176_v40, %v1170_v58 }
 0xf15   : > { %1143 = vrot.lane.b32.xlu2 %v1141_v59, %s1962_s18 }
 0xf16   : > { %1180 = vrot.lane.b32.xlu0 %v1178_v3, %s1962_s18 }
 0xf6f   : > { %v1144_v16 = vpop.permute.xlu2 %1143 }
 0xf70   : > { %v2442_v50 = vadd.f32 %v1144_v16, %v1136_v13 }
 0xf72   : > { %1769 = vtanh.f32 %v2442_v50 }
 0xf78   : > { %v1770_v17 = vpop.eup %1769 }
 0xf79   : > { %1149 = vrot.lane.b32.xlu1 %v1770_v17, %s1963_s19 }
 0xf88   : > { %v1181_v27 = vpop.permute.xlu0 %1180 }
 0xf89   : > { %v2453_v46 = vadd.f32 %v1181_v27, %v1173_v51 }
 0xf8b   : > { %1771 = vtanh.f32 %v2453_v46 }
 0xf91   : > { %v1772_v4 = vpop.eup %1771 }
 0xf92   : > { %1186 = vrot.lane.b32.xlu2 %v1772_v4, %s1963_s19 }
 0xfeb   : > { %v1150_v56 = vpop.permute.xlu1 %1149 }
 0xfec   : > { %v1187_v2 = vpop.permute.xlu2 %1186  ;;  %v2457_v25 = vmul.f32 %v1150_v56, %v1133_v39 }
 0xfed   : > { %v2459_v26 = vmul.f32 %v1187_v2, %v1170_v58 }
 0xfee   : > { %v2465_v52 = vsel %vm588_vm10, %v2457_v25, %v2415_v49  ;;  %v1190_v35 = vsel %vm588_vm10, %v2457_v25, 0.0 }
 0xfef   : > { %v2471_v62 = vsel %vm582_vm9, %v2459_v26, %v2421_v45  ;;  %1197 = vrot.lane.b32.xlu0 %v2465_v52, %s1964_s20 }
 0xff0   : > { %1201 = vrot.lane.b32.xlu1 %v2471_v62, %s1963_s19 }
0x1061   : > { %v1198_v30 = vpop.permute.xlu0 %1197 }
0x1062   : > { %v1202_v31 = vpop.permute.xlu1 %1201 }
0x1063   : > { %v1204_v10 = vsel %vm319_vm0, %v1198_v30, %v1202_v31 }
0x1064   : > { %1577 = vmatmul.msk.f32.vlgmr.msra.gmra.mxu0 %vm344_vm13, %v1204_v10 }
0x10e1   : > { %v1225_v49 = vpop.f32.mrf.mxu0 }
0x10e2   : > { %v1228_v48 = vadd.f32 %v1789_v9, %v1225_v49  ;;  %v1229_v33 = vadd.f32 %v1790_v32, %v1225_v49  ;;  %v713_v9 = vsel %vm712_vm14, %v2239_v19, 0.0  ;;  %v1076_v32 = vsel %vm718_vm15, %v2407_v0, 0.0 }
0x10e3   : > { %v1193_v19 = vsel %vm588_vm10, %v2442_v50, %v2439_v54  ;;  %v583_v54 = vsel %vm582_vm9, %v2175_v63, 0.0  ;;  %v1191_v50 = vsel %vm582_vm9, %v2459_v26, 0.0  ;;  %v849_v63 = vsel %vm848_vm4, %v2314_v38, 0.0 }
0x10e4   : > { %1773 = vtanh.f32 %v1228_v48  ;;  %v1578_v36 = vmul.f32 -1.442695, %v1228_v48  ;;  %v1579_v43 = vmul.f32 -1.442695, %v1229_v33  ;;  %v963_v48 = vsel %vm842_vm3, %v2359_v47, 0.0 }
0x10e5   : > { %1775 = vtanh.f32 %v1229_v33  ;;  %v589_v33 = vsel %vm588_vm10, %v2186_v7, 0.0  ;;  %v1195_v47 = vsel %vm582_vm9, %v2453_v46, %v2450_v15  ;;  %v1077_v15 = vsel %vm712_vm14, %v2409_v12, 0.0 }
0x10e6   : > { %1777 = vpow2.f32 %v1578_v36  ;;  %v843_v46 = vsel %vm842_vm3, %v2303_v57, 0.0  ;;  %vm2662_vm9 = vcmp.eq.s32.totalorder %v2122_v1, 1  ;;  %vm2664_vm10 = vcmp.eq.s32.totalorder %v2113_v61, 1 }
0x10e7   : > { %vm2663_vm14 = vmmov %vm2662_vm9  ;;  %vm1313_vm15 = vcmask 253952  }
0x10e8   : > { %vm2665_vm3 = vmmov %vm2664_vm10 }
0x10ea   : > { %v1774_v45 = vpop.eup %1773 }
0x10eb   : > { %v1776_v34 = vpop.eup %1775  ;;  %1252 = vrot.lane.b32.xlu2 %v1774_v45, %s1960_s14 }
0x10ec   : > { %1289 = vrot.lane.b32.xlu0 %v1776_v34, %s1960_s14  ;;  %v1778_v37 = vpop.eup %1777 }
0x10ed   : > { %v1233_v41 = vadd.f32 1.0, %v1778_v37 }
0x10ef   : > { %1779 = vrcp.f32 %v1233_v41  ;;  %v1245_v28 = vand.u32 2147483648, %v1233_v41  ;;  %vm1239_vm13 = vweird.f32 %v1233_v41  ;;  %v1243_v55 = vand.u32 2147483647, %v1233_v41 }
0x10f0   : > { %1781 = vpow2.f32 %v1579_v43 }
0x10f1   : > { %v1246_v40 = vor.u32 1.1754944e-38, %v1245_v28  ;;  %vm1244_vm7 = vcmp.eq.f32.partialorder %v1243_v55, 8.507059e+37 }
0x10f5   : > { %v1780_v42 = vpop.eup %1779 }
0x10f6   : > { %v1235_v44 = vmul.f32 %v1780_v42, %v1233_v41  ;;  %v1782_v24 = vpop.eup %1781  ;;  %vm1240_vm12 = vweird.f32 %v1780_v42 }
0x10f7   : > { %v1270_v29 = vadd.f32 1.0, %v1782_v24  ;;  %vm1241_vm6 = vmor %vm1239_vm13, %vm1240_vm12 }
0x10f8   : > { %v1236_v11 = vsub.f32 1.0, %v1235_v44 }
0x10f9   : > { %1783 = vrcp.f32 %v1270_v29  ;;  %v1282_v4 = vand.u32 2147483648, %v1270_v29  ;;  %vm1276_vm1 = vweird.f32 %v1270_v29  ;;  %v1280_v56 = vand.u32 2147483647, %v1270_v29 }
0x10fa   : > { %v1237_v14 = vmul.f32 %v1780_v42, %v1236_v11 }
0x10fb   : > { %v1283_v30 = vor.u32 1.1754944e-38, %v1282_v4  ;;  %vm1281_vm5 = vcmp.eq.f32.partialorder %v1280_v56, 8.507059e+37 }
0x10fc   : > { %v1238_v53 = vadd.f32 %v1780_v42, %v1237_v14 }
0x10fe   : > { %v1242_v39 = vsel %vm1241_vm6, %v1780_v42, %v1238_v53 }
0x10ff   : > { %v1247_v59 = vsel %vm1244_vm7, %v1246_v40, %v1242_v39  ;;  %v1784_v13 = vpop.eup %1783 }
0x1100   : > { %v1272_v16 = vmul.f32 %v1784_v13, %v1270_v29  ;;  %vm1277_vm8 = vweird.f32 %v1784_v13  ;;  %v1250_v45 = vmul.f32 %v1247_v59, %v1193_v19 }
0x1101   : > { %vm1278_vm2 = vmor %vm1276_vm1, %vm1277_vm8 }
0x1102   : > { %v1273_v17 = vsub.f32 1.0, %v1272_v16 }
0x1104   : > { %v1274_v51 = vmul.f32 %v1784_v13, %v1273_v17 }
0x1106   : > { %v1275_v27 = vadd.f32 %v1784_v13, %v1274_v51 }
0x1108   : > { %v1279_v2 = vsel %vm1278_vm2, %v1784_v13, %v1275_v27 }
0x1109   : > { %v1284_v10 = vsel %vm1281_vm5, %v1283_v30, %v1279_v2 }
0x110a   : > { %v1287_v0 = vmul.f32 %v1284_v10, %v1195_v47 }
0x1145   : > { %v1253_v58 = vpop.permute.xlu2 %1252 }
0x1146   : > { %v1255_v3 = vmul.f32 %v1253_v58, %v1247_v59 }
0x1148   : > { %1257 = vrot.lane.b32.xlu1 %v1255_v3, %s1962_s18 }
0x115e   : > { %v1290_v31 = vpop.permute.xlu0 %1289 }
0x115f   : > { %v1292_v49 = vmul.f32 %v1290_v31, %v1284_v10 }
0x1161   : > { %1294 = vrot.lane.b32.xlu2 %v1292_v49, %s1962_s18  ;;  %s299_s18 = scalar_lea.vmem [#allocation9], %s2542_s26 }
0x1169   : > { %1326 = vrot.lane.b32.xlu2 %v713_v9, %s1964_s20 }
0x1171   : > { %1340 = vrot.lane.b32.xlu2 %v963_v48, %s1963_s19 }
0x1179   : > { %1356 = vrot.lane.b32.xlu2 %v1076_v32, %s1964_s20 }
0x1181   : > { %1370 = vrot.lane.b32.xlu2 %v589_v33, %s1963_s19 }
0x11ba   : > { %v1258_v34 = vpop.permute.xlu1 %1257 }
0x11bb   : > { %v1295_v36 = vpop.permute.xlu2 %1294  ;;  %v1260_v37 = vadd.f32 %v1258_v34, %v1250_v45 }
0x11bc   : > { %v1297_v41 = vadd.f32 %v1295_v36, %v1287_v0 }
0x11bd   : > { %1785 = vtanh.f32 %v1260_v37 }
0x11be   : > { %1787 = vtanh.f32 %v1297_v41 }
0x11c3   : > { %v1786_v7 = vpop.eup %1785  ;;  %v1327_v38 = vpop.permute.xlu2 %1326 }
0x11c4   : > { %v1788_v42 = vpop.eup %1787  ;;  %1263 = vrot.lane.b32.xlu0 %v1786_v7, %s1963_s19 }
0x11c5   : > { %1300 = vrot.lane.b32.xlu1 %v1788_v42, %s1963_s19 }
0x11cc   : > { %1316 = vrot.lane.b32.xlu0 %v583_v54, %s1964_s20 }
0x11cd   : > { %1320 = vrot.lane.b32.xlu1 %v1191_v50, %s1963_s19 }
0x11d4   : > { %1330 = vrot.lane.b32.xlu0 %v1077_v15, %s1963_s19 }
0x11d5   : > { %1336 = vrot.lane.b32.xlu1 %v843_v46, %s1964_s20 }
0x11dc   : > { %1346 = vrot.lane.b32.xlu0 %v962_v60, %s1964_s20 }
0x11dd   : > { %1350 = vrot.lane.b32.xlu1 %v849_v63, %s1963_s19 }
0x11e4   : > { %1360 = vrot.lane.b32.xlu0 %v719_v18, %s1963_s19 }
0x11e5   : > { %1366 = vrot.lane.b32.xlu1 %v1190_v35, %s1964_s20 }
0x1236   : > { %v1264_v57 = vpop.permute.xlu0 %1263 }
0x1237   : > { %v1301_v23 = vpop.permute.xlu1 %1300  ;;  %v1266_v12 = vmul.f32 %v1264_v57, %v1247_v59 }
0x1238   : > { %v1303_v26 = vmul.f32 %v1301_v23, %v1284_v10 }
0x1239   : > { %v1306_v20 = vsel %vm2662_vm9, %v1266_v12, %v2465_v52  ;;  %v1304_v8 = vsel %vm2663_vm14, %v1266_v12, 0.0  ;;  %v1341_v52 = vpop.permute.xlu2 %1340 }
0x123a   : > { %1382 = vrot.lane.b32.xlu1 %v1306_v20, %s1964_s20  ;;  %1376 = vrot.lane.b32.xlu0 %v1304_v8, %s1964_s20  ;;  %v1305_v21 = vsel %vm2664_vm10, %v1303_v26, 0.0  ;;  %v1307_v1 = vsel %vm2665_vm3, %v1303_v26, %v2471_v62  ;;  %s2595_s20 = sshll.u32 %s1419_s15, 4  ;;  %s1424_s20 = int_to_ptr.hbm [resolvable:$true] %s2595_s20 }
0x123b   : > { %1309 = vrot.lane.b32.xlu2 %v1305_v21, %s1963_s19 }
0x123e   : > { %v1317_v22 = vpop.permute.xlu0 %1316 }
0x123f   : > { %v1321_v25 = vpop.permute.xlu1 %1320 }
0x1240   : > { %v1323_v43 = vsel %vm319_vm0, %v1317_v22, %v1321_v25 }
0x1241   : > { %1324 = vst.msk [vmem:[%s2556_s29 + $0x1] sm:$0x1] %vm1313_vm15, %v1323_v43  ;;  %v1357_v29 = vpop.permute.xlu2 %1356 }
0x1243   : > { %1386 = vrot.lane.b32.xlu2 %v1307_v1, %s1963_s19  ;;  %s2593_s19 = sshll.u32 %s299_s18, 4  ;;  %s1422_s19 = int_to_ptr.vmem [resolvable:$true] %s2593_s19 }
0x1246   : > { %v1331_v44 = vpop.permute.xlu0 %1330 }
0x1247   : > { %v1337_v11 = vpop.permute.xlu1 %1336  ;;  %v1333_v14 = vsel %vm319_vm0, %v1327_v38, %v1331_v44 }
0x1248   : > { %v1343_v24 = vsel %vm319_vm0, %v1337_v11, %v1341_v52  ;;  %1334 = vst.msk [vmem:[%s2556_s29 + $0x2] sm:$0x1] %vm1313_vm15, %v1333_v14 }
0x1249   : > { %1344 = vst.msk [vmem:[%s2556_s29 + $0x3] sm:$0x1] %vm1313_vm15, %v1343_v24  ;;  %v1371_v55 = vpop.permute.xlu2 %1370 }
0x124e   : > { %v1347_v61 = vpop.permute.xlu0 %1346 }
0x124f   : > { %v1351_v62 = vpop.permute.xlu1 %1350 }
0x1250   : > { %v1353_v53 = vsel %vm319_vm0, %v1347_v61, %v1351_v62 }
0x1251   : > { %1354 = vst.msk [vmem:[%s2556_s29 + $0x4] sm:$0x1] %vm1313_vm15, %v1353_v53 }
0x1256   : > { %v1361_v28 = vpop.permute.xlu0 %1360 }
0x1257   : > { %v1367_v39 = vpop.permute.xlu1 %1366  ;;  %v1363_v40 = vsel %vm319_vm0, %v1357_v29, %v1361_v28 }
0x1258   : > { %v1373_v58 = vsel %vm319_vm0, %v1367_v39, %v1371_v55  ;;  %1364 = vst.msk [vmem:[%s2556_s29 + $0x5] sm:$0x1] %vm1313_vm15, %v1363_v40 }
0x1259   : > { %1374 = vst.msk [vmem:[%s2556_s29 + $0x6] sm:$0x1] %vm1313_vm15, %v1373_v58 }
0x1295   : > { %v1310_v59 = vpop.permute.xlu2 %1309 }
0x1296   : > { %v1312_v3 = vsel %vm319_vm0, %v2131_v5, %v1310_v59 }
0x1297   : > { %1314 = vst.msk [vmem:[%s2556_s29] sm:$0x1] %vm1313_vm15, %v1312_v3 }
0x129d   : > { %v1387_v5 = vpop.permute.xlu2 %1386 }
0x12ac   : > { %v1383_v13 = vpop.permute.xlu1 %1382  ;;  %v1377_v16 = vpop.permute.xlu0 %1376 }
0x12ad   : > { %v1389_v17 = vsel %vm319_vm0, %v1383_v13, %v1387_v5  ;;  %v1379_v51 = vsel %vm319_vm0, %v1377_v16, %v2133_v6 }
0x12ae   : > { %1380 = vst.msk [vmem:[%s2556_s29 + $0x7] sm:$0x1] %vm1313_vm15, %v1379_v51 }
0x12af   : > { %1878 = shalt.err (!%p1875_p8)
}
0x12b0   : > { %1592 = dma.vmem_to_hbm [thread:$0]  (%p2038_p5), %s1409_s16, 128, %s1411_s17, %s1392_s25   ;;  %1390 = vst.msk [vmem:[%s299_s18] sm:$0x1] %vm1313_vm15, %v1389_v17 }
0x12b1   : > { %s1397_s29 = scalar_lea.sflag [#allocation10], %s2542_s26  ;;  %s1893_s15 = sshra.s32 %s1424_s20, 4  ;;  %s1894_s15 = int_to_ptr.hbm [resolvable:$true] %s1893_s15 }
0x12b2   : > { %s1895_s10 = scalar_lea.hbm %s1894_s15, 1  ;;  %s1899_s11 = scalar_lea.hbm %s2656_s6, 2 }
0x12b3   : > { %p1896_p9 = scmp.ne.s32.totalorder %s1894_s15, %s1895_s10  ;;  %p1900_p12 = scmp.lt.s32.totalorder %s1894_s15, %s2656_s6 }
0x12b4   : > { %p1901_p13 = scmp.lt.s32.totalorder %s1899_s11, %s1895_s10 }
0x12b5   : > { %p1897_p10 = pnand %p1896_p9, %p2038_p5 }
0x12b6   : > { %p1902_p0 = por %p1901_p13, %p1900_p12 }
0x12b7   : > { %p1898_p11 = pneg %p1897_p10 }
0x12b9   : > { %p1903_p1 = pnand %p1902_p0, %p1898_p11 }
0x12bb   : > { %1906 = shalt.err (!%p1903_p1)
}
0x12bc   : > { %1593 = dma.vmem_to_hbm [thread:$0]  (%p2038_p5), %s1422_s19, 16, %s1424_s20, %s1397_s29  }
0x12bd PF: > { %p1614_p2 = scmp.ge.s32.totalorder %s1953_s24, 2  ;;  %s1435_s26 = sand.u32 1, %s1941_s21  }
0x12be   : > { %s1436_s16 = scalar_lea.sflag [#allocation5], %s1435_s26 }
0x12bf   : > { %p1604_p3 = pnand %p1614_p2, %p2042_p6 }
0x12c1   : > { %p1605_p4 = pneg %p1604_p3 }
0x12c3   : > { %1932 = dma.done.wait (%p1605_p4), %s1436_s16, 128  }
0x12c4   : > { %1934 = vsyncadd (%p1605_p4), %s1436_s16, 4294967168  ;;  %s1446_s17 = scalar_lea.sflag [#allocation10], %s1435_s26 }
0x12c5   : > { %1936 = dma.done.wait (%p1605_p4), %s1446_s17, 16  }
0x12c6   : > { %1938 = vsyncadd (%p1605_p4), %s1446_s17, 4294967280  ;;  %p22_p5 = scmp.ge.s32.totalorder %s2025_s27, 4   ;;  %s2666_s21 = smov %s1945_s22 }
0x12c7   : > { %s2667_s22 = smov %s1949_s23  ;;  %s2668_s23 = smov %s2036_s30 }
0x12c8   : > { %s2669_s24 = smov %s2025_s27  ;;  %24 = sbr.rel (!%p22_p5) target bundleno = 7 (0x7), region = 104 }
0x12cd   :  { %1451 = vsyncpa [#allocation4], 1 }
0x12ce   :  { %1453 = vsyncpa [#allocation4 + $0x1], 1 }
0x12cf   :  { %1454 = vsyncpa [#allocation7], 1 }
0x12d0   :  { %1455 = vsyncpa [#allocation5], 1 }
0x12d1   :  { %1457 = vsyncpa [#allocation5 + $0x1], 1 }
0x12d2   :  { %1458 = vsyncpa [#allocation10], 1 }
0x12d3   :  { %1460 = vsyncpa [#allocation10 + $0x1], 1 }

</bundles_post_ra>
